<compile_context>
chip_gen: v6e
topology: v6e:2x2x1
jax: 0.10.0
libtpu: 0.0.40
codegen_flags: <defaults>
</compile_context>

<pallas_src>
import functools

import jax
import jax.numpy as jnp
import numpy as np
from jax.experimental import pallas as pl
from jax.experimental.pallas import tpu as pltpu


def _make_kernel(num_layers, hidden_dim, seq_len, batch):
    H, T, B = hidden_dim, seq_len, batch

    def kernel(*args):
        x_ref = args[0]                                    # (T*B, Din) bf16, time-major
        layer_refs = args[1:1 + 3 * num_layers]            # (wih_T, whh_T, bias) per layer
        idx = 1 + 3 * num_layers
        w1_ref, b1_ref, w2_ref, b2_ref = args[idx:idx + 4]
        out_ref = args[idx + 4]                            # (B, output_dim) f32

        # Hoisted lane mask selecting the g (cell-candidate) block of [i|f|g|o].
        lane = jax.lax.broadcasted_iota(jnp.int32, (B, 4 * H), 1)
        g_mask = (lane >= 2 * H) & (lane < 3 * H)

        # Layer-0 input projection for ALL timesteps in one MXU pass
        # (bf16 operands, f32 accumulation). Deeper layers have no
        # precomputed projection: their input is the previous layer's h_t,
        # consumed straight out of vregs (wavefront fusion).
        wih0_t = layer_refs[0][...]                        # (Din, 4H) bf16
        bias0 = layer_refs[2][...]                         # (1, 4H)   f32
        x_proj0 = jnp.dot(x_ref[...], wih0_t,
                          preferred_element_type=jnp.float32) + bias0   # (T*B, 4H) f32

        # Per-layer recurrent state. h kept in bf16 (it is the MXU operand);
        # c stays f32.  NOTE: bf16 h rounding compounds over T/layers -- fine
        # at T=8 vs the f32 reference; re-validate for long sequences.
        h_bf = [jnp.zeros((B, H), jnp.bfloat16) for _ in range(num_layers)]
        c = [jnp.zeros((B, H), jnp.float32) for _ in range(num_layers)]
        h_last_bf = h_bf[-1]

        # Static unroll: T and num_layers are tiny here, so every layer-step
        # of every timestep sits in one basic block for the scheduler.
        for t in range(T):
            inp_bf = None                                  # layer (l-1) output at time t
            for l in range(num_layers):
                whh_t = layer_refs[3 * l + 1][...]         # (H, 4H) bf16

                if l == 0:
                    gates = (x_proj0[t * B:(t + 1) * B, :] +
                             jnp.dot(h_bf[0], whh_t,
                                     preferred_element_type=jnp.float32))       # (B,4H) f32
                else:
                    wih_t = layer_refs[3 * l][...]         # (H, 4H) bf16
                    bias = layer_refs[3 * l + 2][...]      # (1, 4H) f32
                    gates = (jnp.dot(inp_bf, wih_t,
                                     preferred_element_type=jnp.float32) + bias +
                             jnp.dot(h_bf[l], whh_t,
                                     preferred_element_type=jnp.float32))       # (B,4H) f32

                # Single-EUP gate nonlinearity: tanh(x) = 2*sigmoid(2x) - 1.
                # Pre-scale g lanes (VPU), one full-width sigmoid (EUP),
                # blend 2*s - 1 back into the g lanes (VPU).
                gates2 = jnp.where(g_mask, 2.0 * gates, gates)
                s = jax.nn.sigmoid(gates2)
                act = jnp.where(g_mask, 2.0 * s - 1.0, s)

                # Per-gate H-lane views (static lane slices).
                # TODO(synk): verify in the Mosaic dump these lower to single
                # lane-rotates; if multiple rotate+mask pairs show up per
                # step, restructure with one pltpu.roll(act, 2H) instead.
                i_g = act[:, 0 * H:1 * H]
                f_g = act[:, 1 * H:2 * H]
                g_g = act[:, 2 * H:3 * H]
                o_g = act[:, 3 * H:4 * H]

                c[l] = f_g * c[l] + i_g * g_g
                h_new = o_g * jnp.tanh(c[l])

                # One bf16 cast per layer-step, reused for the recurrent
                # matmul (next step) and the next layer's input matmul.
                h_new_bf = h_new.astype(jnp.bfloat16)
                h_bf[l] = h_new_bf
                inp_bf = h_new_bf
            # TODO(synk): inter-layer dropout (p=0.2) is identity at inference; not applied.
            h_last_bf = h_bf[num_layers - 1]

        # FC head on the last-timestep hidden of the top layer.
        # bf16 MXU operands, f32 accumulation; elementwise math in f32.
        hid = jnp.maximum(
            jnp.dot(h_last_bf, w1_ref[...],
                    preferred_element_type=jnp.float32) + b1_ref[...],
            0.0)
        out = jnp.dot(hid.astype(jnp.bfloat16), w2_ref[...],
                      preferred_element_type=jnp.float32) + b2_ref[...]
        out_ref[...] = out.astype(out_ref.dtype)

    return kernel


def init_params(key, input_dim, hidden_dim, num_layers, output_dim):
    """Deterministic init mirroring PyTorch's uniform(-1/sqrt(fan), 1/sqrt(fan))."""
    H = hidden_dim
    k = 1.0 / np.sqrt(H)
    layers = []
    for l in range(num_layers):
        din = input_dim if l == 0 else H
        key, k1, k2, k3, k4 = jax.random.split(key, 5)
        w_ih = jax.random.uniform(k1, (4 * H, din), jnp.float32, -k, k)
        w_hh = jax.random.uniform(k2, (4 * H, H), jnp.float32, -k, k)
        b_ih = jax.random.uniform(k3, (4 * H,), jnp.float32, -k, k)
        b_hh = jax.random.uniform(k4, (4 * H,), jnp.float32, -k, k)
        layers.append((w_ih, w_hh, b_ih, b_hh))

    key, k1, k2, k3, k4 = jax.random.split(key, 5)
    kf1 = 1.0 / np.sqrt(H)
    fc1_w = jax.random.uniform(k1, (H // 2, H), jnp.float32, -kf1, kf1)
    fc1_b = jax.random.uniform(k2, (H // 2,), jnp.float32, -kf1, kf1)
    kf2 = 1.0 / np.sqrt(H // 2)
    fc2_w = jax.random.uniform(k3, (output_dim, H // 2), jnp.float32, -kf2, kf2)
    fc2_b = jax.random.uniform(k4, (output_dim,), jnp.float32, -kf2, kf2)
    return layers, fc1_w, fc1_b, fc2_w, fc2_b


def prepare_params(layers, fc1_w, fc1_b, fc2_w, fc2_b):
    """One-time parameter prep (hoisted out of the forward call):
    transposes, b_ih+b_hh fusion, and bf16 casts of ALL MXU weight operands."""
    packed = []
    for (w_ih, w_hh, b_ih, b_hh) in layers:
        packed.append(jnp.asarray(w_ih.T, jnp.bfloat16))                 # (Din_l, 4H)
        packed.append(jnp.asarray(w_hh.T, jnp.bfloat16))                 # (H, 4H)
        packed.append(jnp.asarray((b_ih + b_hh)[None, :], jnp.float32))  # (1, 4H)
    packed.append(jnp.asarray(fc1_w.T, jnp.bfloat16))                    # (H, H//2)
    packed.append(jnp.asarray(fc1_b[None, :], jnp.float32))              # (1, H//2)
    packed.append(jnp.asarray(fc2_w.T, jnp.bfloat16))                    # (H//2, out)
    packed.append(jnp.asarray(fc2_b[None, :], jnp.float32))              # (1, out)
    return tuple(packed)


def lstm_forward(x, params, *, num_layers, hidden_dim, output_dim):
    B, T, Din = x.shape
    # Per-call input prep only: time-major flatten (row t*B + b == x[b, t, :])
    # plus bf16 cast for the MXU. Weight prep lives in prepare_params().
    x_tm = jnp.transpose(x, (1, 0, 2)).reshape(T * B, Din).astype(jnp.bfloat16)

    # Gridless, fully VMEM-resident design. Working set here is a few KB.
    # Size check against the tightest generation (v7x: 64 MiB physical VMEM,
    # 32 MiB scoped default); v5e/v6e have 128 MiB physical.
    working_set = 4 * (T * B * 4 * hidden_dim            # x_proj0 (f32)
                       + 2 * num_layers * B * hidden_dim  # h/c state (f32-equiv)
                       ) + 2 * sum(int(np.prod(p.shape)) for p in params)
    assert working_set < 16 * 1024 * 1024, (
        "Working set no longer trivially VMEM-resident; add a grid / re-tile "
        "against v7x's 64 MiB physical (32 MiB scoped) VMEM.")

    vmem = pl.BlockSpec(memory_space=pltpu.MemorySpace.VMEM)
    kernel = _make_kernel(num_layers, hidden_dim, T, B)

    return pl.pallas_call(
        kernel,
        out_shape=jax.ShapeDtypeStruct((B, output_dim), jnp.float32),
        in_specs=[vmem] * (1 + len(params)),
        out_specs=vmem,
    )(x_tm, *params)


def reference(x, layers, fc1_w, fc1_b, fc2_w, fc2_b):
    """Pure-JAX f32 reference mirroring PyTorch nn.LSTM semantics (i,f,g,o order)."""
    seq = x
    for (w_ih, w_hh, b_ih, b_hh) in layers:
        B, T, _ = seq.shape
        H = w_hh.shape[1]
        h = jnp.zeros((B, H), jnp.float32)
        c = jnp.zeros((B, H), jnp.float32)
        outs = []
        for t in range(T):
            gates = seq[:, t, :] @ w_ih.T + b_ih + h @ w_hh.T + b_hh
            i, f, g, o = jnp.split(gates, 4, axis=-1)
            i, f, o = jax.nn.sigmoid(i), jax.nn.sigmoid(f), jax.nn.sigmoid(o)
            g = jnp.tanh(g)
            c = f * c + i * g
            h = o * jnp.tanh(c)
            outs.append(h)
        seq = jnp.stack(outs, axis=1)
    last = seq[:, -1, :]
    hid = jnp.maximum(last @ fc1_w.T + fc1_b, 0.0)
    return hid @ fc2_w.T + fc2_b


if __name__ == "__main__":
    # Model hyper-parameters implied by the module's __init__ / forward.
    input_dim, hidden_dim, num_layers, output_dim = 4, 32, 2, 1
    batch, seq_len = 2, 8

    key = jax.random.PRNGKey(0)
    key, xk = jax.random.split(key)
    x = jax.random.normal(xk, (batch, seq_len, input_dim), jnp.float32)

    layers, fc1_w, fc1_b, fc2_w, fc2_b = init_params(
        key, input_dim, hidden_dim, num_layers, output_dim)

    # One-time weight prep (transposes, bias fusion, bf16 casts) -- hoisted.
    params = prepare_params(layers, fc1_w, fc1_b, fc2_w, fc2_b)

    fwd = jax.jit(functools.partial(
        lstm_forward, num_layers=num_layers,
        hidden_dim=hidden_dim, output_dim=output_dim))

    out = jax.block_until_ready(fwd(x, params))

    ref = reference(x, layers, fc1_w, fc1_b, fc2_w, fc2_b)
    # bf16 MXU operands (f32 accumulation) vs f32 reference -> looser tolerance.
    np.testing.assert_allclose(np.asarray(out), np.asarray(ref),
                               rtol=5e-2, atol=5e-2)
    print("KERNEL_OK")
</pallas_src>

<mosaic_0001>
module attributes {stable_mosaic.version = 11 : i64} {
  func.func @kernel(%arg0: memref<16x4xbf16, #tpu.memory_space<vmem>>, %arg1: memref<4x128xbf16, #tpu.memory_space<vmem>>, %arg2: memref<32x128xbf16, #tpu.memory_space<vmem>>, %arg3: memref<1x128xf32, #tpu.memory_space<vmem>>, %arg4: memref<32x128xbf16, #tpu.memory_space<vmem>>, %arg5: memref<32x128xbf16, #tpu.memory_space<vmem>>, %arg6: memref<1x128xf32, #tpu.memory_space<vmem>>, %arg7: memref<32x16xbf16, #tpu.memory_space<vmem>>, %arg8: memref<1x16xf32, #tpu.memory_space<vmem>>, %arg9: memref<16x1xbf16, #tpu.memory_space<vmem>>, %arg10: memref<1x1xf32, #tpu.memory_space<vmem>>, %arg11: memref<2x1xf32, #tpu.memory_space<vmem>>) attributes {dimension_semantics = [], scalar_prefetch = 0 : i64, scratch_operands = 0 : i64, tpu.core_type = #tpu.core_type<tc>} {
    %0 = tpu.iota {dimensions = array<i32: 1>} : vector<2x128xi32>
    %c64_i32 = arith.constant 64 : i32
    %1 = vector.broadcast %c64_i32 : i32 to vector<2x128xi32>
    %2 = arith.cmpi sge, %0, %1 : vector<2x128xi32>
    %c96_i32 = arith.constant 96 : i32
    %3 = vector.broadcast %c96_i32 : i32 to vector<2x128xi32>
    %4 = arith.cmpi slt, %0, %3 : vector<2x128xi32>
    %5 = arith.andi %2, %4 : vector<2x128xi1>
    %c0 = arith.constant 0 : index
    %c0_0 = arith.constant 0 : index
    %6 = vector.load %arg1[%c0, %c0_0] : memref<4x128xbf16, #tpu.memory_space<vmem>>, vector<4x128xbf16>
    %c0_1 = arith.constant 0 : index
    %c0_2 = arith.constant 0 : index
    %7 = vector.load %arg3[%c0_1, %c0_2] : memref<1x128xf32, #tpu.memory_space<vmem>>, vector<1x128xf32>
    %c0_3 = arith.constant 0 : index
    %c0_4 = arith.constant 0 : index
    %8 = vector.load %arg0[%c0_3, %c0_4] : memref<16x4xbf16, #tpu.memory_space<vmem>>, vector<16x4xbf16>
    %cst = arith.constant dense<0.000000e+00> : vector<16x128xf32>
    %9 = tpu.matmul %8, %6, %cst {dimension_numbers = #tpu.dot_dimension_numbers<[1], [0], [0], [1], [0, 0, 1, 1], [], []>} : vector<16x4xbf16>, vector<4x128xbf16>, vector<16x128xf32> -> vector<16x128xf32>
    %10 = vector.broadcast %7 : vector<1x128xf32> to vector<16x128xf32>
    %11 = arith.addf %9, %10 : vector<16x128xf32>
    %cst_5 = arith.constant 0.000000e+00 : bf16
    %12 = vector.broadcast %cst_5 : bf16 to vector<2x32xbf16>
    %cst_6 = arith.constant 0.000000e+00 : bf16
    %13 = vector.broadcast %cst_6 : bf16 to vector<2x32xbf16>
    %cst_7 = arith.constant 0.000000e+00 : f32
    %14 = vector.broadcast %cst_7 : f32 to vector<2x32xf32>
    %cst_8 = arith.constant 0.000000e+00 : f32
    %15 = vector.broadcast %cst_8 : f32 to vector<2x32xf32>
    %c0_9 = arith.constant 0 : index
    %c0_10 = arith.constant 0 : index
    %16 = vector.load %arg2[%c0_9, %c0_10] : memref<32x128xbf16, #tpu.memory_space<vmem>>, vector<32x128xbf16>
    %17 = vector.extract_strided_slice %11 {offsets = [0, 0], sizes = [2, 128], strides = [1, 1]} : vector<16x128xf32> to vector<2x128xf32>
    %cst_11 = arith.constant dense<0.000000e+00> : vector<2x128xf32>
    %18 = tpu.matmul %12, %16, %cst_11 {dimension_numbers = #tpu.dot_dimension_numbers<[1], [0], [0], [1], [0, 0, 1, 1], [], []>} : vector<2x32xbf16>, vector<32x128xbf16>, vector<2x128xf32> -> vector<2x128xf32>
    %19 = arith.addf %17, %18 : vector<2x128xf32>
    %cst_12 = arith.constant 2.000000e+00 : f32
    %20 = vector.broadcast %cst_12 : f32 to vector<2x128xf32>
    %21 = arith.mulf %20, %19 : vector<2x128xf32>
    %22 = arith.select %5, %21, %19 : vector<2x128xi1>, vector<2x128xf32>
    %23 = arith.negf %22 : vector<2x128xf32>
    %24 = math.exp %23 : vector<2x128xf32>
    %cst_13 = arith.constant 1.000000e+00 : f32
    %25 = vector.broadcast %cst_13 : f32 to vector<2x128xf32>
    %26 = arith.addf %25, %24 : vector<2x128xf32>
    %27 = arith.divf %25, %26 : vector<2x128xf32>
    %cst_14 = arith.constant 2.000000e+00 : f32
    %28 = vector.broadcast %cst_14 : f32 to vector<2x128xf32>
    %29 = arith.mulf %28, %27 : vector<2x128xf32>
    %cst_15 = arith.constant 1.000000e+00 : f32
    %30 = vector.broadcast %cst_15 : f32 to vector<2x128xf32>
    %31 = arith.subf %29, %30 : vector<2x128xf32>
    %32 = arith.select %5, %31, %27 : vector<2x128xi1>, vector<2x128xf32>
    %33 = vector.extract_strided_slice %32 {offsets = [0, 0], sizes = [2, 32], strides = [1, 1]} : vector<2x128xf32> to vector<2x32xf32>
    %34 = vector.extract_strided_slice %32 {offsets = [0, 32], sizes = [2, 32], strides = [1, 1]} : vector<2x128xf32> to vector<2x32xf32>
    %35 = vector.extract_strided_slice %32 {offsets = [0, 64], sizes = [2, 32], strides = [1, 1]} : vector<2x128xf32> to vector<2x32xf32>
    %36 = vector.extract_strided_slice %32 {offsets = [0, 96], sizes = [2, 32], strides = [1, 1]} : vector<2x128xf32> to vector<2x32xf32>
    %37 = arith.mulf %34, %14 : vector<2x32xf32>
    %38 = arith.mulf %33, %35 : vector<2x32xf32>
    %39 = arith.addf %37, %38 : vector<2x32xf32>
    %40 = math.tanh %39 : vector<2x32xf32>
    %41 = arith.mulf %36, %40 : vector<2x32xf32>
    %42 = arith.truncf %41 : vector<2x32xf32> to vector<2x32xbf16>
    %c0_16 = arith.constant 0 : index
    %c0_17 = arith.constant 0 : index
    %43 = vector.load %arg5[%c0_16, %c0_17] : memref<32x128xbf16, #tpu.memory_space<vmem>>, vector<32x128xbf16>
    %c0_18 = arith.constant 0 : index
    %c0_19 = arith.constant 0 : index
    %44 = vector.load %arg4[%c0_18, %c0_19] : memref<32x128xbf16, #tpu.memory_space<vmem>>, vector<32x128xbf16>
    %c0_20 = arith.constant 0 : index
    %c0_21 = arith.constant 0 : index
    %45 = vector.load %arg6[%c0_20, %c0_21] : memref<1x128xf32, #tpu.memory_space<vmem>>, vector<1x128xf32>
    %cst_22 = arith.constant dense<0.000000e+00> : vector<2x128xf32>
    %46 = tpu.matmul %42, %44, %cst_22 {dimension_numbers = #tpu.dot_dimension_numbers<[1], [0], [0], [1], [0, 0, 1, 1], [], []>} : vector<2x32xbf16>, vector<32x128xbf16>, vector<2x128xf32> -> vector<2x128xf32>
    %47 = vector.broadcast %45 : vector<1x128xf32> to vector<2x128xf32>
    %48 = arith.addf %46, %47 : vector<2x128xf32>
    %cst_23 = arith.constant dense<0.000000e+00> : vector<2x128xf32>
    %49 = tpu.matmul %13, %43, %cst_23 {dimension_numbers = #tpu.dot_dimension_numbers<[1], [0], [0], [1], [0, 0, 1, 1], [], []>} : vector<2x32xbf16>, vector<32x128xbf16>, vector<2x128xf32> -> vector<2x128xf32>
    %50 = arith.addf %48, %49 : vector<2x128xf32>
    %cst_24 = arith.constant 2.000000e+00 : f32
    %51 = vector.broadcast %cst_24 : f32 to vector<2x128xf32>
    %52 = arith.mulf %51, %50 : vector<2x128xf32>
    %53 = arith.select %5, %52, %50 : vector<2x128xi1>, vector<2x128xf32>
    %54 = arith.negf %53 : vector<2x128xf32>
    %55 = math.exp %54 : vector<2x128xf32>
    %cst_25 = arith.constant 1.000000e+00 : f32
    %56 = vector.broadcast %cst_25 : f32 to vector<2x128xf32>
    %57 = arith.addf %56, %55 : vector<2x128xf32>
    %58 = arith.divf %56, %57 : vector<2x128xf32>
    %cst_26 = arith.constant 2.000000e+00 : f32
    %59 = vector.broadcast %cst_26 : f32 to vector<2x128xf32>
    %60 = arith.mulf %59, %58 : vector<2x128xf32>
    %cst_27 = arith.constant 1.000000e+00 : f32
    %61 = vector.broadcast %cst_27 : f32 to vector<2x128xf32>
    %62 = arith.subf %60, %61 : vector<2x128xf32>
    %63 = arith.select %5, %62, %58 : vector<2x128xi1>, vector<2x128xf32>
    %64 = vector.extract_strided_slice %63 {offsets = [0, 0], sizes = [2, 32], strides = [1, 1]} : vector<2x128xf32> to vector<2x32xf32>
    %65 = vector.extract_strided_slice %63 {offsets = [0, 32], sizes = [2, 32], strides = [1, 1]} : vector<2x128xf32> to vector<2x32xf32>
    %66 = vector.extract_strided_slice %63 {offsets = [0, 64], sizes = [2, 32], strides = [1, 1]} : vector<2x128xf32> to vector<2x32xf32>
    %67 = vector.extract_strided_slice %63 {offsets = [0, 96], sizes = [2, 32], strides = [1, 1]} : vector<2x128xf32> to vector<2x32xf32>
    %68 = arith.mulf %65, %15 : vector<2x32xf32>
    %69 = arith.mulf %64, %66 : vector<2x32xf32>
    %70 = arith.addf %68, %69 : vector<2x32xf32>
    %71 = math.tanh %70 : vector<2x32xf32>
    %72 = arith.mulf %67, %71 : vector<2x32xf32>
    %73 = arith.truncf %72 : vector<2x32xf32> to vector<2x32xbf16>
    %c0_28 = arith.constant 0 : index
    %c0_29 = arith.constant 0 : index
    %74 = vector.load %arg2[%c0_28, %c0_29] : memref<32x128xbf16, #tpu.memory_space<vmem>>, vector<32x128xbf16>
    %75 = vector.extract_strided_slice %11 {offsets = [2, 0], sizes = [2, 128], strides = [1, 1]} : vector<16x128xf32> to vector<2x128xf32>
    %cst_30 = arith.constant dense<0.000000e+00> : vector<2x128xf32>
    %76 = tpu.matmul %42, %74, %cst_30 {dimension_numbers = #tpu.dot_dimension_numbers<[1], [0], [0], [1], [0, 0, 1, 1], [], []>} : vector<2x32xbf16>, vector<32x128xbf16>, vector<2x128xf32> -> vector<2x128xf32>
    %77 = arith.addf %75, %76 : vector<2x128xf32>
    %cst_31 = arith.constant 2.000000e+00 : f32
    %78 = vector.broadcast %cst_31 : f32 to vector<2x128xf32>
    %79 = arith.mulf %78, %77 : vector<2x128xf32>
    %80 = arith.select %5, %79, %77 : vector<2x128xi1>, vector<2x128xf32>
    %81 = arith.negf %80 : vector<2x128xf32>
    %82 = math.exp %81 : vector<2x128xf32>
    %cst_32 = arith.constant 1.000000e+00 : f32
    %83 = vector.broadcast %cst_32 : f32 to vector<2x128xf32>
    %84 = arith.addf %83, %82 : vector<2x128xf32>
    %85 = arith.divf %83, %84 : vector<2x128xf32>
    %cst_33 = arith.constant 2.000000e+00 : f32
    %86 = vector.broadcast %cst_33 : f32 to vector<2x128xf32>
    %87 = arith.mulf %86, %85 : vector<2x128xf32>
    %cst_34 = arith.constant 1.000000e+00 : f32
    %88 = vector.broadcast %cst_34 : f32 to vector<2x128xf32>
    %89 = arith.subf %87, %88 : vector<2x128xf32>
    %90 = arith.select %5, %89, %85 : vector<2x128xi1>, vector<2x128xf32>
    %91 = vector.extract_strided_slice %90 {offsets = [0, 0], sizes = [2, 32], strides = [1, 1]} : vector<2x128xf32> to vector<2x32xf32>
    %92 = vector.extract_strided_slice %90 {offsets = [0, 32], sizes = [2, 32], strides = [1, 1]} : vector<2x128xf32> to vector<2x32xf32>
    %93 = vector.extract_strided_slice %90 {offsets = [0, 64], sizes = [2, 32], strides = [1, 1]} : vector<2x128xf32> to vector<2x32xf32>
    %94 = vector.extract_strided_slice %90 {offsets = [0, 96], sizes = [2, 32], strides = [1, 1]} : vector<2x128xf32> to vector<2x32xf32>
    %95 = arith.mulf %92, %39 : vector<2x32xf32>
    %96 = arith.mulf %91, %93 : vector<2x32xf32>
    %97 = arith.addf %95, %96 : vector<2x32xf32>
    %98 = math.tanh %97 : vector<2x32xf32>
    %99 = arith.mulf %94, %98 : vector<2x32xf32>
    %100 = arith.truncf %99 : vector<2x32xf32> to vector<2x32xbf16>
    %c0_35 = arith.constant 0 : index
    %c0_36 = arith.constant 0 : index
    %101 = vector.load %arg5[%c0_35, %c0_36] : memref<32x128xbf16, #tpu.memory_space<vmem>>, vector<32x128xbf16>
    %c0_37 = arith.constant 0 : index
    %c0_38 = arith.constant 0 : index
    %102 = vector.load %arg4[%c0_37, %c0_38] : memref<32x128xbf16, #tpu.memory_space<vmem>>, vector<32x128xbf16>
    %c0_39 = arith.constant 0 : index
    %c0_40 = arith.constant 0 : index
    %103 = vector.load %arg6[%c0_39, %c0_40] : memref<1x128xf32, #tpu.memory_space<vmem>>, vector<1x128xf32>
    %cst_41 = arith.constant dense<0.000000e+00> : vector<2x128xf32>
    %104 = tpu.matmul %100, %102, %cst_41 {dimension_numbers = #tpu.dot_dimension_numbers<[1], [0], [0], [1], [0, 0, 1, 1], [], []>} : vector<2x32xbf16>, vector<32x128xbf16>, vector<2x128xf32> -> vector<2x128xf32>
    %105 = vector.broadcast %103 : vector<1x128xf32> to vector<2x128xf32>
    %106 = arith.addf %104, %105 : vector<2x128xf32>
    %cst_42 = arith.constant dense<0.000000e+00> : vector<2x128xf32>
    %107 = tpu.matmul %73, %101, %cst_42 {dimension_numbers = #tpu.dot_dimension_numbers<[1], [0], [0], [1], [0, 0, 1, 1], [], []>} : vector<2x32xbf16>, vector<32x128xbf16>, vector<2x128xf32> -> vector<2x128xf32>
    %108 = arith.addf %106, %107 : vector<2x128xf32>
    %cst_43 = arith.constant 2.000000e+00 : f32
    %109 = vector.broadcast %cst_43 : f32 to vector<2x128xf32>
    %110 = arith.mulf %109, %108 : vector<2x128xf32>
    %111 = arith.select %5, %110, %108 : vector<2x128xi1>, vector<2x128xf32>
    %112 = arith.negf %111 : vector<2x128xf32>
    %113 = math.exp %112 : vector<2x128xf32>
    %cst_44 = arith.constant 1.000000e+00 : f32
    %114 = vector.broadcast %cst_44 : f32 to vector<2x128xf32>
    %115 = arith.addf %114, %113 : vector<2x128xf32>
    %116 = arith.divf %114, %115 : vector<2x128xf32>
    %cst_45 = arith.constant 2.000000e+00 : f32
    %117 = vector.broadcast %cst_45 : f32 to vector<2x128xf32>
    %118 = arith.mulf %117, %116 : vector<2x128xf32>
    %cst_46 = arith.constant 1.000000e+00 : f32
    %119 = vector.broadcast %cst_46 : f32 to vector<2x128xf32>
    %120 = arith.subf %118, %119 : vector<2x128xf32>
    %121 = arith.select %5, %120, %116 : vector<2x128xi1>, vector<2x128xf32>
    %122 = vector.extract_strided_slice %121 {offsets = [0, 0], sizes = [2, 32], strides = [1, 1]} : vector<2x128xf32> to vector<2x32xf32>
    %123 = vector.extract_strided_slice %121 {offsets = [0, 32], sizes = [2, 32], strides = [1, 1]} : vector<2x128xf32> to vector<2x32xf32>
    %124 = vector.extract_strided_slice %121 {offsets = [0, 64], sizes = [2, 32], strides = [1, 1]} : vector<2x128xf32> to vector<2x32xf32>
    %125 = vector.extract_strided_slice %121 {offsets = [0, 96], sizes = [2, 32], strides = [1, 1]} : vector<2x128xf32> to vector<2x32xf32>
    %126 = arith.mulf %123, %70 : vector<2x32xf32>
    %127 = arith.mulf %122, %124 : vector<2x32xf32>
    %128 = arith.addf %126, %127 : vector<2x32xf32>
    %129 = math.tanh %128 : vector<2x32xf32>
    %130 = arith.mulf %125, %129 : vector<2x32xf32>
    %131 = arith.truncf %130 : vector<2x32xf32> to vector<2x32xbf16>
    %c0_47 = arith.constant 0 : index
    %c0_48 = arith.constant 0 : index
    %132 = vector.load %arg2[%c0_47, %c0_48] : memref<32x128xbf16, #tpu.memory_space<vmem>>, vector<32x128xbf16>
    %133 = vector.extract_strided_slice %11 {offsets = [4, 0], sizes = [2, 128], strides = [1, 1]} : vector<16x128xf32> to vector<2x128xf32>
    %cst_49 = arith.constant dense<0.000000e+00> : vector<2x128xf32>
    %134 = tpu.matmul %100, %132, %cst_49 {dimension_numbers = #tpu.dot_dimension_numbers<[1], [0], [0], [1], [0, 0, 1, 1], [], []>} : vector<2x32xbf16>, vector<32x128xbf16>, vector<2x128xf32> -> vector<2x128xf32>
    %135 = arith.addf %133, %134 : vector<2x128xf32>
    %cst_50 = arith.constant 2.000000e+00 : f32
    %136 = vector.broadcast %cst_50 : f32 to vector<2x128xf32>
    %137 = arith.mulf %136, %135 : vector<2x128xf32>
    %138 = arith.select %5, %137, %135 : vector<2x128xi1>, vector<2x128xf32>
    %139 = arith.negf %138 : vector<2x128xf32>
    %140 = math.exp %139 : vector<2x128xf32>
    %cst_51 = arith.constant 1.000000e+00 : f32
    %141 = vector.broadcast %cst_51 : f32 to vector<2x128xf32>
    %142 = arith.addf %141, %140 : vector<2x128xf32>
    %143 = arith.divf %141, %142 : vector<2x128xf32>
    %cst_52 = arith.constant 2.000000e+00 : f32
    %144 = vector.broadcast %cst_52 : f32 to vector<2x128xf32>
    %145 = arith.mulf %144, %143 : vector<2x128xf32>
    %cst_53 = arith.constant 1.000000e+00 : f32
    %146 = vector.broadcast %cst_53 : f32 to vector<2x128xf32>
    %147 = arith.subf %145, %146 : vector<2x128xf32>
    %148 = arith.select %5, %147, %143 : vector<2x128xi1>, vector<2x128xf32>
    %149 = vector.extract_strided_slice %148 {offsets = [0, 0], sizes = [2, 32], strides = [1, 1]} : vector<2x128xf32> to vector<2x32xf32>
    %150 = vector.extract_strided_slice %148 {offsets = [0, 32], sizes = [2, 32], strides = [1, 1]} : vector<2x128xf32> to vector<2x32xf32>
    %151 = vector.extract_strided_slice %148 {offsets = [0, 64], sizes = [2, 32], strides = [1, 1]} : vector<2x128xf32> to vector<2x32xf32>
    %152 = vector.extract_strided_slice %148 {offsets = [0, 96], sizes = [2, 32], strides = [1, 1]} : vector<2x128xf32> to vector<2x32xf32>
    %153 = arith.mulf %150, %97 : vector<2x32xf32>
    %154 = arith.mulf %149, %151 : vector<2x32xf32>
    %155 = arith.addf %153, %154 : vector<2x32xf32>
    %156 = math.tanh %155 : vector<2x32xf32>
    %157 = arith.mulf %152, %156 : vector<2x32xf32>
    %158 = arith.truncf %157 : vector<2x32xf32> to vector<2x32xbf16>
    %c0_54 = arith.constant 0 : index
    %c0_55 = arith.constant 0 : index
    %159 = vector.load %arg5[%c0_54, %c0_55] : memref<32x128xbf16, #tpu.memory_space<vmem>>, vector<32x128xbf16>
    %c0_56 = arith.constant 0 : index
    %c0_57 = arith.constant 0 : index
    %160 = vector.load %arg4[%c0_56, %c0_57] : memref<32x128xbf16, #tpu.memory_space<vmem>>, vector<32x128xbf16>
    %c0_58 = arith.constant 0 : index
    %c0_59 = arith.constant 0 : index
    %161 = vector.load %arg6[%c0_58, %c0_59] : memref<1x128xf32, #tpu.memory_space<vmem>>, vector<1x128xf32>
    %cst_60 = arith.constant dense<0.000000e+00> : vector<2x128xf32>
    %162 = tpu.matmul %158, %160, %cst_60 {dimension_numbers = #tpu.dot_dimension_numbers<[1], [0], [0], [1], [0, 0, 1, 1], [], []>} : vector<2x32xbf16>, vector<32x128xbf16>, vector<2x128xf32> -> vector<2x128xf32>
    %163 = vector.broadcast %161 : vector<1x128xf32> to vector<2x128xf32>
    %164 = arith.addf %162, %163 : vector<2x128xf32>
    %cst_61 = arith.constant dense<0.000000e+00> : vector<2x128xf32>
    %165 = tpu.matmul %131, %159, %cst_61 {dimension_numbers = #tpu.dot_dimension_numbers<[1], [0], [0], [1], [0, 0, 1, 1], [], []>} : vector<2x32xbf16>, vector<32x128xbf16>, vector<2x128xf32> -> vector<2x128xf32>
    %166 = arith.addf %164, %165 : vector<2x128xf32>
    %cst_62 = arith.constant 2.000000e+00 : f32
    %167 = vector.broadcast %cst_62 : f32 to vector<2x128xf32>
    %168 = arith.mulf %167, %166 : vector<2x128xf32>
    %169 = arith.select %5, %168, %166 : vector<2x128xi1>, vector<2x128xf32>
    %170 = arith.negf %169 : vector<2x128xf32>
    %171 = math.exp %170 : vector<2x128xf32>
    %cst_63 = arith.constant 1.000000e+00 : f32
    %172 = vector.broadcast %cst_63 : f32 to vector<2x128xf32>
    %173 = arith.addf %172, %171 : vector<2x128xf32>
    %174 = arith.divf %172, %173 : vector<2x128xf32>
    %cst_64 = arith.constant 2.000000e+00 : f32
    %175 = vector.broadcast %cst_64 : f32 to vector<2x128xf32>
    %176 = arith.mulf %175, %174 : vector<2x128xf32>
    %cst_65 = arith.constant 1.000000e+00 : f32
    %177 = vector.broadcast %cst_65 : f32 to vector<2x128xf32>
    %178 = arith.subf %176, %177 : vector<2x128xf32>
    %179 = arith.select %5, %178, %174 : vector<2x128xi1>, vector<2x128xf32>
    %180 = vector.extract_strided_slice %179 {offsets = [0, 0], sizes = [2, 32], strides = [1, 1]} : vector<2x128xf32> to vector<2x32xf32>
    %181 = vector.extract_strided_slice %179 {offsets = [0, 32], sizes = [2, 32], strides = [1, 1]} : vector<2x128xf32> to vector<2x32xf32>
    %182 = vector.extract_strided_slice %179 {offsets = [0, 64], sizes = [2, 32], strides = [1, 1]} : vector<2x128xf32> to vector<2x32xf32>
    %183 = vector.extract_strided_slice %179 {offsets = [0, 96], sizes = [2, 32], strides = [1, 1]} : vector<2x128xf32> to vector<2x32xf32>
    %184 = arith.mulf %181, %128 : vector<2x32xf32>
    %185 = arith.mulf %180, %182 : vector<2x32xf32>
    %186 = arith.addf %184, %185 : vector<2x32xf32>
    %187 = math.tanh %186 : vector<2x32xf32>
    %188 = arith.mulf %183, %187 : vector<2x32xf32>
    %189 = arith.truncf %188 : vector<2x32xf32> to vector<2x32xbf16>
    %c0_66 = arith.constant 0 : index
    %c0_67 = arith.constant 0 : index
    %190 = vector.load %arg2[%c0_66, %c0_67] : memref<32x128xbf16, #tpu.memory_space<vmem>>, vector<32x128xbf16>
    %191 = vector.extract_strided_slice %11 {offsets = [6, 0], sizes = [2, 128], strides = [1, 1]} : vector<16x128xf32> to vector<2x128xf32>
    %cst_68 = arith.constant dense<0.000000e+00> : vector<2x128xf32>
    %192 = tpu.matmul %158, %190, %cst_68 {dimension_numbers = #tpu.dot_dimension_numbers<[1], [0], [0], [1], [0, 0, 1, 1], [], []>} : vector<2x32xbf16>, vector<32x128xbf16>, vector<2x128xf32> -> vector<2x128xf32>
    %193 = arith.addf %191, %192 : vector<2x128xf32>
    %cst_69 = arith.constant 2.000000e+00 : f32
    %194 = vector.broadcast %cst_69 : f32 to vector<2x128xf32>
    %195 = arith.mulf %194, %193 : vector<2x128xf32>
    %196 = arith.select %5, %195, %193 : vector<2x128xi1>, vector<2x128xf32>
    %197 = arith.negf %196 : vector<2x128xf32>
    %198 = math.exp %197 : vector<2x128xf32>
    %cst_70 = arith.constant 1.000000e+00 : f32
    %199 = vector.broadcast %cst_70 : f32 to vector<2x128xf32>
    %200 = arith.addf %199, %198 : vector<2x128xf32>
    %201 = arith.divf %199, %200 : vector<2x128xf32>
    %cst_71 = arith.constant 2.000000e+00 : f32
    %202 = vector.broadcast %cst_71 : f32 to vector<2x128xf32>
    %203 = arith.mulf %202, %201 : vector<2x128xf32>
    %cst_72 = arith.constant 1.000000e+00 : f32
    %204 = vector.broadcast %cst_72 : f32 to vector<2x128xf32>
    %205 = arith.subf %203, %204 : vector<2x128xf32>
    %206 = arith.select %5, %205, %201 : vector<2x128xi1>, vector<2x128xf32>
    %207 = vector.extract_strided_slice %206 {offsets = [0, 0], sizes = [2, 32], strides = [1, 1]} : vector<2x128xf32> to vector<2x32xf32>
    %208 = vector.extract_strided_slice %206 {offsets = [0, 32], sizes = [2, 32], strides = [1, 1]} : vector<2x128xf32> to vector<2x32xf32>
    %209 = vector.extract_strided_slice %206 {offsets = [0, 64], sizes = [2, 32], strides = [1, 1]} : vector<2x128xf32> to vector<2x32xf32>
    %210 = vector.extract_strided_slice %206 {offsets = [0, 96], sizes = [2, 32], strides = [1, 1]} : vector<2x128xf32> to vector<2x32xf32>
    %211 = arith.mulf %208, %155 : vector<2x32xf32>
    %212 = arith.mulf %207, %209 : vector<2x32xf32>
    %213 = arith.addf %211, %212 : vector<2x32xf32>
    %214 = math.tanh %213 : vector<2x32xf32>
    %215 = arith.mulf %210, %214 : vector<2x32xf32>
    %216 = arith.truncf %215 : vector<2x32xf32> to vector<2x32xbf16>
    %c0_73 = arith.constant 0 : index
    %c0_74 = arith.constant 0 : index
    %217 = vector.load %arg5[%c0_73, %c0_74] : memref<32x128xbf16, #tpu.memory_space<vmem>>, vector<32x128xbf16>
    %c0_75 = arith.constant 0 : index
    %c0_76 = arith.constant 0 : index
    %218 = vector.load %arg4[%c0_75, %c0_76] : memref<32x128xbf16, #tpu.memory_space<vmem>>, vector<32x128xbf16>
    %c0_77 = arith.constant 0 : index
    %c0_78 = arith.constant 0 : index
    %219 = vector.load %arg6[%c0_77, %c0_78] : memref<1x128xf32, #tpu.memory_space<vmem>>, vector<1x128xf32>
    %cst_79 = arith.constant dense<0.000000e+00> : vector<2x128xf32>
    %220 = tpu.matmul %216, %218, %cst_79 {dimension_numbers = #tpu.dot_dimension_numbers<[1], [0], [0], [1], [0, 0, 1, 1], [], []>} : vector<2x32xbf16>, vector<32x128xbf16>, vector<2x128xf32> -> vector<2x128xf32>
    %221 = vector.broadcast %219 : vector<1x128xf32> to vector<2x128xf32>
    %222 = arith.addf %220, %221 : vector<2x128xf32>
    %cst_80 = arith.constant dense<0.000000e+00> : vector<2x128xf32>
    %223 = tpu.matmul %189, %217, %cst_80 {dimension_numbers = #tpu.dot_dimension_numbers<[1], [0], [0], [1], [0, 0, 1, 1], [], []>} : vector<2x32xbf16>, vector<32x128xbf16>, vector<2x128xf32> -> vector<2x128xf32>
    %224 = arith.addf %222, %223 : vector<2x128xf32>
    %cst_81 = arith.constant 2.000000e+00 : f32
    %225 = vector.broadcast %cst_81 : f32 to vector<2x128xf32>
    %226 = arith.mulf %225, %224 : vector<2x128xf32>
    %227 = arith.select %5, %226, %224 : vector<2x128xi1>, vector<2x128xf32>
    %228 = arith.negf %227 : vector<2x128xf32>
    %229 = math.exp %228 : vector<2x128xf32>
    %cst_82 = arith.constant 1.000000e+00 : f32
    %230 = vector.broadcast %cst_82 : f32 to vector<2x128xf32>
    %231 = arith.addf %230, %229 : vector<2x128xf32>
    %232 = arith.divf %230, %231 : vector<2x128xf32>
    %cst_83 = arith.constant 2.000000e+00 : f32
    %233 = vector.broadcast %cst_83 : f32 to vector<2x128xf32>
    %234 = arith.mulf %233, %232 : vector<2x128xf32>
    %cst_84 = arith.constant 1.000000e+00 : f32
    %235 = vector.broadcast %cst_84 : f32 to vector<2x128xf32>
    %236 = arith.subf %234, %235 : vector<2x128xf32>
    %237 = arith.select %5, %236, %232 : vector<2x128xi1>, vector<2x128xf32>
    %238 = vector.extract_strided_slice %237 {offsets = [0, 0], sizes = [2, 32], strides = [1, 1]} : vector<2x128xf32> to vector<2x32xf32>
    %239 = vector.extract_strided_slice %237 {offsets = [0, 32], sizes = [2, 32], strides = [1, 1]} : vector<2x128xf32> to vector<2x32xf32>
    %240 = vector.extract_strided_slice %237 {offsets = [0, 64], sizes = [2, 32], strides = [1, 1]} : vector<2x128xf32> to vector<2x32xf32>
    %241 = vector.extract_strided_slice %237 {offsets = [0, 96], sizes = [2, 32], strides = [1, 1]} : vector<2x128xf32> to vector<2x32xf32>
    %242 = arith.mulf %239, %186 : vector<2x32xf32>
    %243 = arith.mulf %238, %240 : vector<2x32xf32>
    %244 = arith.addf %242, %243 : vector<2x32xf32>
    %245 = math.tanh %244 : vector<2x32xf32>
    %246 = arith.mulf %241, %245 : vector<2x32xf32>
    %247 = arith.truncf %246 : vector<2x32xf32> to vector<2x32xbf16>
    %c0_85 = arith.constant 0 : index
    %c0_86 = arith.constant 0 : index
    %248 = vector.load %arg2[%c0_85, %c0_86] : memref<32x128xbf16, #tpu.memory_space<vmem>>, vector<32x128xbf16>
    %249 = vector.extract_strided_slice %11 {offsets = [8, 0], sizes = [2, 128], strides = [1, 1]} : vector<16x128xf32> to vector<2x128xf32>
    %cst_87 = arith.constant dense<0.000000e+00> : vector<2x128xf32>
    %250 = tpu.matmul %216, %248, %cst_87 {dimension_numbers = #tpu.dot_dimension_numbers<[1], [0], [0], [1], [0, 0, 1, 1], [], []>} : vector<2x32xbf16>, vector<32x128xbf16>, vector<2x128xf32> -> vector<2x128xf32>
    %251 = arith.addf %249, %250 : vector<2x128xf32>
    %cst_88 = arith.constant 2.000000e+00 : f32
    %252 = vector.broadcast %cst_88 : f32 to vector<2x128xf32>
    %253 = arith.mulf %252, %251 : vector<2x128xf32>
    %254 = arith.select %5, %253, %251 : vector<2x128xi1>, vector<2x128xf32>
    %255 = arith.negf %254 : vector<2x128xf32>
    %256 = math.exp %255 : vector<2x128xf32>
    %cst_89 = arith.constant 1.000000e+00 : f32
    %257 = vector.broadcast %cst_89 : f32 to vector<2x128xf32>
    %258 = arith.addf %257, %256 : vector<2x128xf32>
    %259 = arith.divf %257, %258 : vector<2x128xf32>
    %cst_90 = arith.constant 2.000000e+00 : f32
    %260 = vector.broadcast %cst_90 : f32 to vector<2x128xf32>
    %261 = arith.mulf %260, %259 : vector<2x128xf32>
    %cst_91 = arith.constant 1.000000e+00 : f32
    %262 = vector.broadcast %cst_91 : f32 to vector<2x128xf32>
    %263 = arith.subf %261, %262 : vector<2x128xf32>
    %264 = arith.select %5, %263, %259 : vector<2x128xi1>, vector<2x128xf32>
    %265 = vector.extract_strided_slice %264 {offsets = [0, 0], sizes = [2, 32], strides = [1, 1]} : vector<2x128xf32> to vector<2x32xf32>
    %266 = vector.extract_strided_slice %264 {offsets = [0, 32], sizes = [2, 32], strides = [1, 1]} : vector<2x128xf32> to vector<2x32xf32>
    %267 = vector.extract_strided_slice %264 {offsets = [0, 64], sizes = [2, 32], strides = [1, 1]} : vector<2x128xf32> to vector<2x32xf32>
    %268 = vector.extract_strided_slice %264 {offsets = [0, 96], sizes = [2, 32], strides = [1, 1]} : vector<2x128xf32> to vector<2x32xf32>
    %269 = arith.mulf %266, %213 : vector<2x32xf32>
    %270 = arith.mulf %265, %267 : vector<2x32xf32>
    %271 = arith.addf %269, %270 : vector<2x32xf32>
    %272 = math.tanh %271 : vector<2x32xf32>
    %273 = arith.mulf %268, %272 : vector<2x32xf32>
    %274 = arith.truncf %273 : vector<2x32xf32> to vector<2x32xbf16>
    %c0_92 = arith.constant 0 : index
    %c0_93 = arith.constant 0 : index
    %275 = vector.load %arg5[%c0_92, %c0_93] : memref<32x128xbf16, #tpu.memory_space<vmem>>, vector<32x128xbf16>
    %c0_94 = arith.constant 0 : index
    %c0_95 = arith.constant 0 : index
    %276 = vector.load %arg4[%c0_94, %c0_95] : memref<32x128xbf16, #tpu.memory_space<vmem>>, vector<32x128xbf16>
    %c0_96 = arith.constant 0 : index
    %c0_97 = arith.constant 0 : index
    %277 = vector.load %arg6[%c0_96, %c0_97] : memref<1x128xf32, #tpu.memory_space<vmem>>, vector<1x128xf32>
    %cst_98 = arith.constant dense<0.000000e+00> : vector<2x128xf32>
    %278 = tpu.matmul %274, %276, %cst_98 {dimension_numbers = #tpu.dot_dimension_numbers<[1], [0], [0], [1], [0, 0, 1, 1], [], []>} : vector<2x32xbf16>, vector<32x128xbf16>, vector<2x128xf32> -> vector<2x128xf32>
    %279 = vector.broadcast %277 : vector<1x128xf32> to vector<2x128xf32>
    %280 = arith.addf %278, %279 : vector<2x128xf32>
    %cst_99 = arith.constant dense<0.000000e+00> : vector<2x128xf32>
    %281 = tpu.matmul %247, %275, %cst_99 {dimension_numbers = #tpu.dot_dimension_numbers<[1], [0], [0], [1], [0, 0, 1, 1], [], []>} : vector<2x32xbf16>, vector<32x128xbf16>, vector<2x128xf32> -> vector<2x128xf32>
    %282 = arith.addf %280, %281 : vector<2x128xf32>
    %cst_100 = arith.constant 2.000000e+00 : f32
    %283 = vector.broadcast %cst_100 : f32 to vector<2x128xf32>
    %284 = arith.mulf %283, %282 : vector<2x128xf32>
    %285 = arith.select %5, %284, %282 : vector<2x128xi1>, vector<2x128xf32>
    %286 = arith.negf %285 : vector<2x128xf32>
    %287 = math.exp %286 : vector<2x128xf32>
    %cst_101 = arith.constant 1.000000e+00 : f32
    %288 = vector.broadcast %cst_101 : f32 to vector<2x128xf32>
    %289 = arith.addf %288, %287 : vector<2x128xf32>
    %290 = arith.divf %288, %289 : vector<2x128xf32>
    %cst_102 = arith.constant 2.000000e+00 : f32
    %291 = vector.broadcast %cst_102 : f32 to vector<2x128xf32>
    %292 = arith.mulf %291, %290 : vector<2x128xf32>
    %cst_103 = arith.constant 1.000000e+00 : f32
    %293 = vector.broadcast %cst_103 : f32 to vector<2x128xf32>
    %294 = arith.subf %292, %293 : vector<2x128xf32>
    %295 = arith.select %5, %294, %290 : vector<2x128xi1>, vector<2x128xf32>
    %296 = vector.extract_strided_slice %295 {offsets = [0, 0], sizes = [2, 32], strides = [1, 1]} : vector<2x128xf32> to vector<2x32xf32>
    %297 = vector.extract_strided_slice %295 {offsets = [0, 32], sizes = [2, 32], strides = [1, 1]} : vector<2x128xf32> to vector<2x32xf32>
    %298 = vector.extract_strided_slice %295 {offsets = [0, 64], sizes = [2, 32], strides = [1, 1]} : vector<2x128xf32> to vector<2x32xf32>
    %299 = vector.extract_strided_slice %295 {offsets = [0, 96], sizes = [2, 32], strides = [1, 1]} : vector<2x128xf32> to vector<2x32xf32>
    %300 = arith.mulf %297, %244 : vector<2x32xf32>
    %301 = arith.mulf %296, %298 : vector<2x32xf32>
    %302 = arith.addf %300, %301 : vector<2x32xf32>
    %303 = math.tanh %302 : vector<2x32xf32>
    %304 = arith.mulf %299, %303 : vector<2x32xf32>
    %305 = arith.truncf %304 : vector<2x32xf32> to vector<2x32xbf16>
    %c0_104 = arith.constant 0 : index
    %c0_105 = arith.constant 0 : index
    %306 = vector.load %arg2[%c0_104, %c0_105] : memref<32x128xbf16, #tpu.memory_space<vmem>>, vector<32x128xbf16>
    %307 = vector.extract_strided_slice %11 {offsets = [10, 0], sizes = [2, 128], strides = [1, 1]} : vector<16x128xf32> to vector<2x128xf32>
    %cst_106 = arith.constant dense<0.000000e+00> : vector<2x128xf32>
    %308 = tpu.matmul %274, %306, %cst_106 {dimension_numbers = #tpu.dot_dimension_numbers<[1], [0], [0], [1], [0, 0, 1, 1], [], []>} : vector<2x32xbf16>, vector<32x128xbf16>, vector<2x128xf32> -> vector<2x128xf32>
    %309 = arith.addf %307, %308 : vector<2x128xf32>
    %cst_107 = arith.constant 2.000000e+00 : f32
    %310 = vector.broadcast %cst_107 : f32 to vector<2x128xf32>
    %311 = arith.mulf %310, %309 : vector<2x128xf32>
    %312 = arith.select %5, %311, %309 : vector<2x128xi1>, vector<2x128xf32>
    %313 = arith.negf %312 : vector<2x128xf32>
    %314 = math.exp %313 : vector<2x128xf32>
    %cst_108 = arith.constant 1.000000e+00 : f32
    %315 = vector.broadcast %cst_108 : f32 to vector<2x128xf32>
    %316 = arith.addf %315, %314 : vector<2x128xf32>
    %317 = arith.divf %315, %316 : vector<2x128xf32>
    %cst_109 = arith.constant 2.000000e+00 : f32
    %318 = vector.broadcast %cst_109 : f32 to vector<2x128xf32>
    %319 = arith.mulf %318, %317 : vector<2x128xf32>
    %cst_110 = arith.constant 1.000000e+00 : f32
    %320 = vector.broadcast %cst_110 : f32 to vector<2x128xf32>
    %321 = arith.subf %319, %320 : vector<2x128xf32>
    %322 = arith.select %5, %321, %317 : vector<2x128xi1>, vector<2x128xf32>
    %323 = vector.extract_strided_slice %322 {offsets = [0, 0], sizes = [2, 32], strides = [1, 1]} : vector<2x128xf32> to vector<2x32xf32>
    %324 = vector.extract_strided_slice %322 {offsets = [0, 32], sizes = [2, 32], strides = [1, 1]} : vector<2x128xf32> to vector<2x32xf32>
    %325 = vector.extract_strided_slice %322 {offsets = [0, 64], sizes = [2, 32], strides = [1, 1]} : vector<2x128xf32> to vector<2x32xf32>
    %326 = vector.extract_strided_slice %322 {offsets = [0, 96], sizes = [2, 32], strides = [1, 1]} : vector<2x128xf32> to vector<2x32xf32>
    %327 = arith.mulf %324, %271 : vector<2x32xf32>
    %328 = arith.mulf %323, %325 : vector<2x32xf32>
    %329 = arith.addf %327, %328 : vector<2x32xf32>
    %330 = math.tanh %329 : vector<2x32xf32>
    %331 = arith.mulf %326, %330 : vector<2x32xf32>
    %332 = arith.truncf %331 : vector<2x32xf32> to vector<2x32xbf16>
    %c0_111 = arith.constant 0 : index
    %c0_112 = arith.constant 0 : index
    %333 = vector.load %arg5[%c0_111, %c0_112] : memref<32x128xbf16, #tpu.memory_space<vmem>>, vector<32x128xbf16>
    %c0_113 = arith.constant 0 : index
    %c0_114 = arith.constant 0 : index
    %334 = vector.load %arg4[%c0_113, %c0_114] : memref<32x128xbf16, #tpu.memory_space<vmem>>, vector<32x128xbf16>
    %c0_115 = arith.constant 0 : index
    %c0_116 = arith.constant 0 : index
    %335 = vector.load %arg6[%c0_115, %c0_116] : memref<1x128xf32, #tpu.memory_space<vmem>>, vector<1x128xf32>
    %cst_117 = arith.constant dense<0.000000e+00> : vector<2x128xf32>
    %336 = tpu.matmul %332, %334, %cst_117 {dimension_numbers = #tpu.dot_dimension_numbers<[1], [0], [0], [1], [0, 0, 1, 1], [], []>} : vector<2x32xbf16>, vector<32x128xbf16>, vector<2x128xf32> -> vector<2x128xf32>
    %337 = vector.broadcast %335 : vector<1x128xf32> to vector<2x128xf32>
    %338 = arith.addf %336, %337 : vector<2x128xf32>
    %cst_118 = arith.constant dense<0.000000e+00> : vector<2x128xf32>
    %339 = tpu.matmul %305, %333, %cst_118 {dimension_numbers = #tpu.dot_dimension_numbers<[1], [0], [0], [1], [0, 0, 1, 1], [], []>} : vector<2x32xbf16>, vector<32x128xbf16>, vector<2x128xf32> -> vector<2x128xf32>
    %340 = arith.addf %338, %339 : vector<2x128xf32>
    %cst_119 = arith.constant 2.000000e+00 : f32
    %341 = vector.broadcast %cst_119 : f32 to vector<2x128xf32>
    %342 = arith.mulf %341, %340 : vector<2x128xf32>
    %343 = arith.select %5, %342, %340 : vector<2x128xi1>, vector<2x128xf32>
    %344 = arith.negf %343 : vector<2x128xf32>
    %345 = math.exp %344 : vector<2x128xf32>
    %cst_120 = arith.constant 1.000000e+00 : f32
    %346 = vector.broadcast %cst_120 : f32 to vector<2x128xf32>
    %347 = arith.addf %346, %345 : vector<2x128xf32>
    %348 = arith.divf %346, %347 : vector<2x128xf32>
    %cst_121 = arith.constant 2.000000e+00 : f32
    %349 = vector.broadcast %cst_121 : f32 to vector<2x128xf32>
    %350 = arith.mulf %349, %348 : vector<2x128xf32>
    %cst_122 = arith.constant 1.000000e+00 : f32
    %351 = vector.broadcast %cst_122 : f32 to vector<2x128xf32>
    %352 = arith.subf %350, %351 : vector<2x128xf32>
    %353 = arith.select %5, %352, %348 : vector<2x128xi1>, vector<2x128xf32>
    %354 = vector.extract_strided_slice %353 {offsets = [0, 0], sizes = [2, 32], strides = [1, 1]} : vector<2x128xf32> to vector<2x32xf32>
    %355 = vector.extract_strided_slice %353 {offsets = [0, 32], sizes = [2, 32], strides = [1, 1]} : vector<2x128xf32> to vector<2x32xf32>
    %356 = vector.extract_strided_slice %353 {offsets = [0, 64], sizes = [2, 32], strides = [1, 1]} : vector<2x128xf32> to vector<2x32xf32>
    %357 = vector.extract_strided_slice %353 {offsets = [0, 96], sizes = [2, 32], strides = [1, 1]} : vector<2x128xf32> to vector<2x32xf32>
    %358 = arith.mulf %355, %302 : vector<2x32xf32>
    %359 = arith.mulf %354, %356 : vector<2x32xf32>
    %360 = arith.addf %358, %359 : vector<2x32xf32>
    %361 = math.tanh %360 : vector<2x32xf32>
    %362 = arith.mulf %357, %361 : vector<2x32xf32>
    %363 = arith.truncf %362 : vector<2x32xf32> to vector<2x32xbf16>
    %c0_123 = arith.constant 0 : index
    %c0_124 = arith.constant 0 : index
    %364 = vector.load %arg2[%c0_123, %c0_124] : memref<32x128xbf16, #tpu.memory_space<vmem>>, vector<32x128xbf16>
    %365 = vector.extract_strided_slice %11 {offsets = [12, 0], sizes = [2, 128], strides = [1, 1]} : vector<16x128xf32> to vector<2x128xf32>
    %cst_125 = arith.constant dense<0.000000e+00> : vector<2x128xf32>
    %366 = tpu.matmul %332, %364, %cst_125 {dimension_numbers = #tpu.dot_dimension_numbers<[1], [0], [0], [1], [0, 0, 1, 1], [], []>} : vector<2x32xbf16>, vector<32x128xbf16>, vector<2x128xf32> -> vector<2x128xf32>
    %367 = arith.addf %365, %366 : vector<2x128xf32>
    %cst_126 = arith.constant 2.000000e+00 : f32
    %368 = vector.broadcast %cst_126 : f32 to vector<2x128xf32>
    %369 = arith.mulf %368, %367 : vector<2x128xf32>
    %370 = arith.select %5, %369, %367 : vector<2x128xi1>, vector<2x128xf32>
    %371 = arith.negf %370 : vector<2x128xf32>
    %372 = math.exp %371 : vector<2x128xf32>
    %cst_127 = arith.constant 1.000000e+00 : f32
    %373 = vector.broadcast %cst_127 : f32 to vector<2x128xf32>
    %374 = arith.addf %373, %372 : vector<2x128xf32>
    %375 = arith.divf %373, %374 : vector<2x128xf32>
    %cst_128 = arith.constant 2.000000e+00 : f32
    %376 = vector.broadcast %cst_128 : f32 to vector<2x128xf32>
    %377 = arith.mulf %376, %375 : vector<2x128xf32>
    %cst_129 = arith.constant 1.000000e+00 : f32
    %378 = vector.broadcast %cst_129 : f32 to vector<2x128xf32>
    %379 = arith.subf %377, %378 : vector<2x128xf32>
    %380 = arith.select %5, %379, %375 : vector<2x128xi1>, vector<2x128xf32>
    %381 = vector.extract_strided_slice %380 {offsets = [0, 0], sizes = [2, 32], strides = [1, 1]} : vector<2x128xf32> to vector<2x32xf32>
    %382 = vector.extract_strided_slice %380 {offsets = [0, 32], sizes = [2, 32], strides = [1, 1]} : vector<2x128xf32> to vector<2x32xf32>
    %383 = vector.extract_strided_slice %380 {offsets = [0, 64], sizes = [2, 32], strides = [1, 1]} : vector<2x128xf32> to vector<2x32xf32>
    %384 = vector.extract_strided_slice %380 {offsets = [0, 96], sizes = [2, 32], strides = [1, 1]} : vector<2x128xf32> to vector<2x32xf32>
    %385 = arith.mulf %382, %329 : vector<2x32xf32>
    %386 = arith.mulf %381, %383 : vector<2x32xf32>
    %387 = arith.addf %385, %386 : vector<2x32xf32>
    %388 = math.tanh %387 : vector<2x32xf32>
    %389 = arith.mulf %384, %388 : vector<2x32xf32>
    %390 = arith.truncf %389 : vector<2x32xf32> to vector<2x32xbf16>
    %c0_130 = arith.constant 0 : index
    %c0_131 = arith.constant 0 : index
    %391 = vector.load %arg5[%c0_130, %c0_131] : memref<32x128xbf16, #tpu.memory_space<vmem>>, vector<32x128xbf16>
    %c0_132 = arith.constant 0 : index
    %c0_133 = arith.constant 0 : index
    %392 = vector.load %arg4[%c0_132, %c0_133] : memref<32x128xbf16, #tpu.memory_space<vmem>>, vector<32x128xbf16>
    %c0_134 = arith.constant 0 : index
    %c0_135 = arith.constant 0 : index
    %393 = vector.load %arg6[%c0_134, %c0_135] : memref<1x128xf32, #tpu.memory_space<vmem>>, vector<1x128xf32>
    %cst_136 = arith.constant dense<0.000000e+00> : vector<2x128xf32>
    %394 = tpu.matmul %390, %392, %cst_136 {dimension_numbers = #tpu.dot_dimension_numbers<[1], [0], [0], [1], [0, 0, 1, 1], [], []>} : vector<2x32xbf16>, vector<32x128xbf16>, vector<2x128xf32> -> vector<2x128xf32>
    %395 = vector.broadcast %393 : vector<1x128xf32> to vector<2x128xf32>
    %396 = arith.addf %394, %395 : vector<2x128xf32>
    %cst_137 = arith.constant dense<0.000000e+00> : vector<2x128xf32>
    %397 = tpu.matmul %363, %391, %cst_137 {dimension_numbers = #tpu.dot_dimension_numbers<[1], [0], [0], [1], [0, 0, 1, 1], [], []>} : vector<2x32xbf16>, vector<32x128xbf16>, vector<2x128xf32> -> vector<2x128xf32>
    %398 = arith.addf %396, %397 : vector<2x128xf32>
    %cst_138 = arith.constant 2.000000e+00 : f32
    %399 = vector.broadcast %cst_138 : f32 to vector<2x128xf32>
    %400 = arith.mulf %399, %398 : vector<2x128xf32>
    %401 = arith.select %5, %400, %398 : vector<2x128xi1>, vector<2x128xf32>
    %402 = arith.negf %401 : vector<2x128xf32>
    %403 = math.exp %402 : vector<2x128xf32>
    %cst_139 = arith.constant 1.000000e+00 : f32
    %404 = vector.broadcast %cst_139 : f32 to vector<2x128xf32>
    %405 = arith.addf %404, %403 : vector<2x128xf32>
    %406 = arith.divf %404, %405 : vector<2x128xf32>
    %cst_140 = arith.constant 2.000000e+00 : f32
    %407 = vector.broadcast %cst_140 : f32 to vector<2x128xf32>
    %408 = arith.mulf %407, %406 : vector<2x128xf32>
    %cst_141 = arith.constant 1.000000e+00 : f32
    %409 = vector.broadcast %cst_141 : f32 to vector<2x128xf32>
    %410 = arith.subf %408, %409 : vector<2x128xf32>
    %411 = arith.select %5, %410, %406 : vector<2x128xi1>, vector<2x128xf32>
    %412 = vector.extract_strided_slice %411 {offsets = [0, 0], sizes = [2, 32], strides = [1, 1]} : vector<2x128xf32> to vector<2x32xf32>
    %413 = vector.extract_strided_slice %411 {offsets = [0, 32], sizes = [2, 32], strides = [1, 1]} : vector<2x128xf32> to vector<2x32xf32>
    %414 = vector.extract_strided_slice %411 {offsets = [0, 64], sizes = [2, 32], strides = [1, 1]} : vector<2x128xf32> to vector<2x32xf32>
    %415 = vector.extract_strided_slice %411 {offsets = [0, 96], sizes = [2, 32], strides = [1, 1]} : vector<2x128xf32> to vector<2x32xf32>
    %416 = arith.mulf %413, %360 : vector<2x32xf32>
    %417 = arith.mulf %412, %414 : vector<2x32xf32>
    %418 = arith.addf %416, %417 : vector<2x32xf32>
    %419 = math.tanh %418 : vector<2x32xf32>
    %420 = arith.mulf %415, %419 : vector<2x32xf32>
    %421 = arith.truncf %420 : vector<2x32xf32> to vector<2x32xbf16>
    %c0_142 = arith.constant 0 : index
    %c0_143 = arith.constant 0 : index
    %422 = vector.load %arg2[%c0_142, %c0_143] : memref<32x128xbf16, #tpu.memory_space<vmem>>, vector<32x128xbf16>
    %423 = vector.extract_strided_slice %11 {offsets = [14, 0], sizes = [2, 128], strides = [1, 1]} : vector<16x128xf32> to vector<2x128xf32>
    %cst_144 = arith.constant dense<0.000000e+00> : vector<2x128xf32>
    %424 = tpu.matmul %390, %422, %cst_144 {dimension_numbers = #tpu.dot_dimension_numbers<[1], [0], [0], [1], [0, 0, 1, 1], [], []>} : vector<2x32xbf16>, vector<32x128xbf16>, vector<2x128xf32> -> vector<2x128xf32>
    %425 = arith.addf %423, %424 : vector<2x128xf32>
    %cst_145 = arith.constant 2.000000e+00 : f32
    %426 = vector.broadcast %cst_145 : f32 to vector<2x128xf32>
    %427 = arith.mulf %426, %425 : vector<2x128xf32>
    %428 = arith.select %5, %427, %425 : vector<2x128xi1>, vector<2x128xf32>
    %429 = arith.negf %428 : vector<2x128xf32>
    %430 = math.exp %429 : vector<2x128xf32>
    %cst_146 = arith.constant 1.000000e+00 : f32
    %431 = vector.broadcast %cst_146 : f32 to vector<2x128xf32>
    %432 = arith.addf %431, %430 : vector<2x128xf32>
    %433 = arith.divf %431, %432 : vector<2x128xf32>
    %cst_147 = arith.constant 2.000000e+00 : f32
    %434 = vector.broadcast %cst_147 : f32 to vector<2x128xf32>
    %435 = arith.mulf %434, %433 : vector<2x128xf32>
    %cst_148 = arith.constant 1.000000e+00 : f32
    %436 = vector.broadcast %cst_148 : f32 to vector<2x128xf32>
    %437 = arith.subf %435, %436 : vector<2x128xf32>
    %438 = arith.select %5, %437, %433 : vector<2x128xi1>, vector<2x128xf32>
    %439 = vector.extract_strided_slice %438 {offsets = [0, 0], sizes = [2, 32], strides = [1, 1]} : vector<2x128xf32> to vector<2x32xf32>
    %440 = vector.extract_strided_slice %438 {offsets = [0, 32], sizes = [2, 32], strides = [1, 1]} : vector<2x128xf32> to vector<2x32xf32>
    %441 = vector.extract_strided_slice %438 {offsets = [0, 64], sizes = [2, 32], strides = [1, 1]} : vector<2x128xf32> to vector<2x32xf32>
    %442 = vector.extract_strided_slice %438 {offsets = [0, 96], sizes = [2, 32], strides = [1, 1]} : vector<2x128xf32> to vector<2x32xf32>
    %443 = arith.mulf %440, %387 : vector<2x32xf32>
    %444 = arith.mulf %439, %441 : vector<2x32xf32>
    %445 = arith.addf %443, %444 : vector<2x32xf32>
    %446 = math.tanh %445 : vector<2x32xf32>
    %447 = arith.mulf %442, %446 : vector<2x32xf32>
    %448 = arith.truncf %447 : vector<2x32xf32> to vector<2x32xbf16>
    %c0_149 = arith.constant 0 : index
    %c0_150 = arith.constant 0 : index
    %449 = vector.load %arg5[%c0_149, %c0_150] : memref<32x128xbf16, #tpu.memory_space<vmem>>, vector<32x128xbf16>
    %c0_151 = arith.constant 0 : index
    %c0_152 = arith.constant 0 : index
    %450 = vector.load %arg4[%c0_151, %c0_152] : memref<32x128xbf16, #tpu.memory_space<vmem>>, vector<32x128xbf16>
    %c0_153 = arith.constant 0 : index
    %c0_154 = arith.constant 0 : index
    %451 = vector.load %arg6[%c0_153, %c0_154] : memref<1x128xf32, #tpu.memory_space<vmem>>, vector<1x128xf32>
    %cst_155 = arith.constant dense<0.000000e+00> : vector<2x128xf32>
    %452 = tpu.matmul %448, %450, %cst_155 {dimension_numbers = #tpu.dot_dimension_numbers<[1], [0], [0], [1], [0, 0, 1, 1], [], []>} : vector<2x32xbf16>, vector<32x128xbf16>, vector<2x128xf32> -> vector<2x128xf32>
    %453 = vector.broadcast %451 : vector<1x128xf32> to vector<2x128xf32>
    %454 = arith.addf %452, %453 : vector<2x128xf32>
    %cst_156 = arith.constant dense<0.000000e+00> : vector<2x128xf32>
    %455 = tpu.matmul %421, %449, %cst_156 {dimension_numbers = #tpu.dot_dimension_numbers<[1], [0], [0], [1], [0, 0, 1, 1], [], []>} : vector<2x32xbf16>, vector<32x128xbf16>, vector<2x128xf32> -> vector<2x128xf32>
    %456 = arith.addf %454, %455 : vector<2x128xf32>
    %cst_157 = arith.constant 2.000000e+00 : f32
    %457 = vector.broadcast %cst_157 : f32 to vector<2x128xf32>
    %458 = arith.mulf %457, %456 : vector<2x128xf32>
    %459 = arith.select %5, %458, %456 : vector<2x128xi1>, vector<2x128xf32>
    %460 = arith.negf %459 : vector<2x128xf32>
    %461 = math.exp %460 : vector<2x128xf32>
    %cst_158 = arith.constant 1.000000e+00 : f32
    %462 = vector.broadcast %cst_158 : f32 to vector<2x128xf32>
    %463 = arith.addf %462, %461 : vector<2x128xf32>
    %464 = arith.divf %462, %463 : vector<2x128xf32>
    %cst_159 = arith.constant 2.000000e+00 : f32
    %465 = vector.broadcast %cst_159 : f32 to vector<2x128xf32>
    %466 = arith.mulf %465, %464 : vector<2x128xf32>
    %cst_160 = arith.constant 1.000000e+00 : f32
    %467 = vector.broadcast %cst_160 : f32 to vector<2x128xf32>
    %468 = arith.subf %466, %467 : vector<2x128xf32>
    %469 = arith.select %5, %468, %464 : vector<2x128xi1>, vector<2x128xf32>
    %470 = vector.extract_strided_slice %469 {offsets = [0, 0], sizes = [2, 32], strides = [1, 1]} : vector<2x128xf32> to vector<2x32xf32>
    %471 = vector.extract_strided_slice %469 {offsets = [0, 32], sizes = [2, 32], strides = [1, 1]} : vector<2x128xf32> to vector<2x32xf32>
    %472 = vector.extract_strided_slice %469 {offsets = [0, 64], sizes = [2, 32], strides = [1, 1]} : vector<2x128xf32> to vector<2x32xf32>
    %473 = vector.extract_strided_slice %469 {offsets = [0, 96], sizes = [2, 32], strides = [1, 1]} : vector<2x128xf32> to vector<2x32xf32>
    %474 = arith.mulf %471, %418 : vector<2x32xf32>
    %475 = arith.mulf %470, %472 : vector<2x32xf32>
    %476 = arith.addf %474, %475 : vector<2x32xf32>
    %477 = math.tanh %476 : vector<2x32xf32>
    %478 = arith.mulf %473, %477 : vector<2x32xf32>
    %479 = arith.truncf %478 : vector<2x32xf32> to vector<2x32xbf16>
    %c0_161 = arith.constant 0 : index
    %c0_162 = arith.constant 0 : index
    %480 = vector.load %arg7[%c0_161, %c0_162] : memref<32x16xbf16, #tpu.memory_space<vmem>>, vector<32x16xbf16>
    %cst_163 = arith.constant dense<0.000000e+00> : vector<2x16xf32>
    %481 = tpu.matmul %479, %480, %cst_163 {dimension_numbers = #tpu.dot_dimension_numbers<[1], [0], [0], [1], [0, 0, 1, 1], [], []>} : vector<2x32xbf16>, vector<32x16xbf16>, vector<2x16xf32> -> vector<2x16xf32>
    %c0_164 = arith.constant 0 : index
    %c0_165 = arith.constant 0 : index
    %482 = vector.load %arg8[%c0_164, %c0_165] : memref<1x16xf32, #tpu.memory_space<vmem>>, vector<1x16xf32>
    %483 = vector.broadcast %482 : vector<1x16xf32> to vector<2x16xf32>
    %484 = arith.addf %481, %483 : vector<2x16xf32>
    %cst_166 = arith.constant 0.000000e+00 : f32
    %485 = vector.broadcast %cst_166 : f32 to vector<2x16xf32>
    %486 = arith.maximumf %484, %485 : vector<2x16xf32>
    %487 = arith.truncf %486 : vector<2x16xf32> to vector<2x16xbf16>
    %c0_167 = arith.constant 0 : index
    %c0_168 = arith.constant 0 : index
    %488 = vector.load %arg9[%c0_167, %c0_168] : memref<16x1xbf16, #tpu.memory_space<vmem>>, vector<16x1xbf16>
    %cst_169 = arith.constant dense<0.000000e+00> : vector<2x1xf32>
    %489 = tpu.matmul %487, %488, %cst_169 {dimension_numbers = #tpu.dot_dimension_numbers<[1], [0], [0], [1], [0, 0, 1, 1], [], []>} : vector<2x16xbf16>, vector<16x1xbf16>, vector<2x1xf32> -> vector<2x1xf32>
    %c0_170 = arith.constant 0 : index
    %c0_171 = arith.constant 0 : index
    %490 = vector.load %arg10[%c0_170, %c0_171] : memref<1x1xf32, #tpu.memory_space<vmem>>, vector<1x1xf32>
    %491 = vector.broadcast %490 : vector<1x1xf32> to vector<2x1xf32>
    %492 = arith.addf %489, %491 : vector<2x1xf32>
    %c0_172 = arith.constant 0 : index
    %c0_173 = arith.constant 0 : index
    %493 = vector.load %arg11[%c0_172, %c0_173] : memref<2x1xf32, #tpu.memory_space<vmem>>, vector<2x1xf32>
    tpu.vector_store %arg11[%c0_172, %c0_173], %492 {strides = array<i32>} : memref<2x1xf32, #tpu.memory_space<vmem>>, vector<2x1xf32>,
    return
  }
}

</mosaic_0001>

<bundles_post_ra>
// kernel: lstm_forward.1
= control target key start
LH: loop header
LB: loop body
LE: loop exit
PB: predicated region body
PF: predicated region fallthrough
CT: control target
= control target key end

     0   :  { %vm65_vm0 = vcmask 1041408   ;;  %v2360_v0 = vmov 0.0   ;;  %vm2361_vm1 = vmmov 0   ;;  %vm61_vm2 = vcmask 31744   ;;  %s2364_s25 = smov 32   ;;  %s2891_s1 = inlined_call_operand.vmem [shape: bf16[4,128], index: 1, kind: input, shape index: {}]   ;;  %s2892_s2 = inlined_call_operand.vmem [shape: bf16[32,128], index: 2, kind: input, shape index: {}]   ;;  %s2893_s0 = inlined_call_operand.vmem [shape: bf16[16,4], index: 0, kind: input, shape index: {}]   ;;  %s2894_s3 = inlined_call_operand.vmem [shape: f32[1,128], index: 3, kind: input, shape index: {}]   ;;  %s2895_s4 = inlined_call_operand.vmem [shape: bf16[32,128], index: 4, kind: input, shape index: {}]   ;;  %s2896_s5 = inlined_call_operand.vmem [shape: bf16[32,128], index: 5, kind: input, shape index: {}]   ;;  %s2897_s6 = inlined_call_operand.vmem [shape: f32[1,128], index: 6, kind: input, shape index: {}]   ;;  %s2898_s7 = inlined_call_operand.vmem [shape: bf16[32,16], index: 7, kind: input, shape index: {}]   ;;  %s2899_s9 = inlined_call_operand.vmem [shape: bf16[16,1], index: 9, kind: input, shape index: {}]   ;;  %s2900_s10 = inlined_call_operand.<no memory space> [shape: f32[1,1], index: 10, kind: input, shape index: {}]   ;;  %s2901_s8 = inlined_call_operand.vmem [shape: f32[1,16], index: 8, kind: input, shape index: {}]   ;;  %s2902_s11 = inlined_call_operand.vmem [shape: f32[2,1], index: 11, kind: output, shape index: {}]  }
   0x1   :  { %2030 = vmatprep.subr.bf16.mxu0 %v2360_v0  ;;  %v46_v1 = vld [vmem:[%s2891_s1] sm:$0x3]  ;;  %2036 = vmatprep.subr.bf16.mxu1 %v2360_v0  ;;  %v2433_v3 = vld [vmem:[%s2892_s2 + $0x8] sm:$0xff]   ;;  %v2362_v6 = vmov 0   ;;  %v41_v7 = vlaneseq  ;;  %vm126_vm6 = vcmask 261120   ;;  %vm1830_vm7 = vcmask 130048  }
   0x2   :  { %v67_v2 = vsel %vm65_vm0, %v46_v1, 0  ;;  %2032 = vmatprep.mubr.msk.bf16.mxu0 %vm2361_vm1, %v2360_v0  ;;  %2040 = vmatprep.mubr.msk.bf16.mxu1 %vm2361_vm1, %v2360_v0  ;;  %v2248_v4 = vld [vmem:[%s2893_s0] sm:$0xff]   ;;  %v2480_v36 = vld [vmem:[%s2895_s4 + $0x8] sm:$0xff]   ;;  %vm1874_vm8 = vcmask 1024  }
   0x3   :  { %2031 = vmatpush3.bf16.msra.mxu0 %v67_v2  ;;  %2037 = vmatpush3.bf16.msra.mxu1 %v2433_v3  ;;  %v2446_v5 = vld [vmem:[%s2892_s2] sm:$0xff]   ;;  %v42_v10 = vand.u32 127, %v41_v7  ;;  %v2485_v37 = vld [vmem:[%s2896_s5 + $0x8] sm:$0xff]  }
   0x4   :  { %2044 = vmatprep.subr.bf16.mxu0 %v2360_v0  ;;  %2038 = vmatprep.subr.bf16.mxu1 %v2360_v0  ;;  %v1880_v8 = vld [vmem:[%s2894_s3] ss:$0 sm:$0xff]  ;;  %s2363_s3 = smov 64  }
   0x5   :  { %vm43_vm3 = vcmp.ge.s32.totalorder %v42_v10, 64  ;;  %vm44_vm4 = vcmp.lt.s32.totalorder %v42_v10, 96  ;;  %v2491_v38 = vld [vmem:[%s2895_s4] sm:$0xff]  }
   0x6   :  { %2033 = vmatmul.mubr.msk.bf16.vlgmr.msra.gmra.mxu0 %vm61_vm2, %v2248_v4  ;;  %vm2464_vm5 = vmand %vm43_vm3, %vm44_vm4  ;;  %v2498_v39 = vld [vmem:[%s2896_s5] sm:$0xff]  }
   0x7   :  { %2048 = vmatprep.mubr.msk.bf16.mxu0 %vm2361_vm1, %v2360_v0  ;;  %2039 = vmatpush3.bf16.msra.mxu1 %v2446_v5  ;;  %v2530_v49 = vld [vmem:[%s2897_s6] ss:$0 sm:$0xff] }
   0x8   :  { %2052 = vmatprep.subr.bf16.mxu1 %v2360_v0  ;;  %2045 = vmatpush3.bf16.msra.mxu0 %v2480_v36  ;;  %v2255_v18 = vld [vmem:[%s2898_s7] sm:$0xff]  }
   0x9   :  { %2046 = vmatprep.subr.bf16.mxu0 %v2360_v0 }
   0xa   :  { %2041 = vmatmul.mubr.bf16.vlgmr.msra.gmra.mxu1 %v2362_v6 }
   0xb   :  { %2056 = vmatprep.mubr.msk.bf16.mxu1 %vm2361_vm1, %v2360_v0  ;;  %2053 = vmatpush3.bf16.msra.mxu1 %v2485_v37 }
   0xc   :  { %2054 = vmatprep.subr.bf16.mxu1 %v2360_v0  ;;  %2047 = vmatpush3.bf16.msra.mxu0 %v2491_v38 }
   0xd   :  { %2060 = vmatprep.subr.bf16.mxu0 %v2360_v0 }
   0xf   :  { %2055 = vmatpush3.bf16.msra.mxu1 %v2498_v39 }
  0x10   :  { %2068 = vmatprep.subr.bf16.mxu1 %v2360_v0 }
  0x12   :  { %2057 = vmatmul.mubr.bf16.vlgmr.msra.gmra.mxu1 %v2362_v6 }
  0x13   :  { %2069 = vmatpush3.bf16.msra.mxu1 %v2480_v36  ;;  %2072 = vmatprep.mubr.msk.bf16.mxu1 %vm2361_vm1, %v2360_v0 }
  0x14   :  { %2070 = vmatprep.subr.bf16.mxu1 %v2360_v0 }
  0x17   :  { %2071 = vmatpush3.bf16.msra.mxu1 %v2491_v38 }
  0x18   :  { %2084 = vmatprep.subr.bf16.mxu1 %v2360_v0 }
  0xc6   :  { %v103_v9 = vpop.f32.mrf.mxu0 }
  0xc7   :  { %v2459_v11 = vadd.f32 %v1880_v8, %v103_v9 }
  0xc8   :  { %v2034_v12 = vpop.f32.mrf.mxu0 }
  0xca   :  { %v106_v13 = vpop.f32.mrf.mxu0  ;;  %v164_v15 = vpop.f32.mrf.mxu1 }
  0xcb   :  { %v2461_v14 = vadd.f32 %v1880_v8, %v106_v13  ;;  %v170_v16 = vadd.f32 %v164_v15, %v2459_v11 }
  0xcc   :  { %v2035_v17 = vpop.f32.mrf.mxu0  ;;  %v2042_v19 = vpop.f32.mrf.mxu1 }
  0xcd   :  { %v171_v20 = vmul.f32 2.0, %v170_v16 }
  0xce   :  { %v167_v21 = vpop.f32.mrf.mxu1 }
  0xcf   :  { %v172_v22 = vsel %vm2464_vm5, %v171_v20, %v170_v16 }
  0xd0   :  { %v1885_v23 = vmul.f32 -1.442695, %v172_v22  ;;  %v2043_v24 = vpop.f32.mrf.mxu1 }
  0xd2   :  { %2257 = vpow2.f32 %v1885_v23  ;;  %v319_v45 = vpop.f32.mrf.mxu1 }
  0xd4   :  { %v2058_v46 = vpop.f32.mrf.mxu1 }
  0xd6   :  { %v322_v47 = vpop.f32.mrf.mxu1 }
  0xd8   :  { %v2059_v48 = vpop.f32.mrf.mxu1 }
  0xdf   :  { %v2258_v25 = vpop.eup %2257 }
  0xe0   :  { %v176_v26 = vadd.f32 1.0, %v2258_v25 }
  0xe2   :  { %2259 = vrcp.f32 %v176_v26 }
  0xef   :  { %v2260_v27 = vpop.eup %2259 }
  0xf0   :  { %v179_v28 = vmul.f32 2.0, %v2260_v27 }
  0xf2   :  { %v1886_v29 = vadd.f32 -1.0, %v179_v28 }
  0xf4   :  { %v181_v30 = vsel %vm2464_vm5, %v1886_v29, %v2260_v27 }
  0xf5   :  { %184 = vrot.lane.b32.xlu0 %v181_v30, %s2363_s3  ;;  %v182_v33 = vmul.f32 0.0, %v181_v30 }
 0x167   :  { %v185_v31 = vpop.permute.xlu0 %184 }
 0x168   :  { %v187_v32 = vmul.f32 %v185_v31, %v181_v30 }
 0x16a   :  { %189 = vrot.lane.b32.xlu0 %v187_v32, %s2364_s25 }
 0x1dc   :  { %v190_v34 = vpop.permute.xlu0 %189 }
 0x1dd   :  { %v2474_v35 = vadd.f32 %v190_v34, %v182_v33 }
 0x1df   :  { %2261 = vtanh.f32 %v2474_v35  ;;  %v411_v26 = vrot.slane %v2474_v35, 6 }
 0x1ec   :  { %v2262_v40 = vpop.eup %2261 }
 0x1ed   :  { %195 = vrot.lane.b32.xlu1 %v2262_v40, %s2363_s3 }
 0x25f   :  { %v196_v41 = vpop.permute.xlu1 %195 }
 0x260   :  { %v198_v42 = vmul.f32 %v196_v41, %v181_v30 }
 0x262   :  { %v199_v43 = vpack.c.bf16 %v198_v42, %v198_v42 }
 0x264   :  { %216 = vrot.lane.b32.xlu1 %v199_v43, %s2364_s25 }
 0x2d6   :  { %v217_v44 = vpop.permute.xlu1 %216 }
 0x2d7   :  { %2049 = vmatmul.mubr.msk.bf16.vlgmr.msra.gmra.mxu0 %vm126_vm6, %v217_v44 }
 0x2d8   :  { %2061 = vmatpush3.bf16.msra.mxu0 %v2433_v3  ;;  %2064 = vmatprep.mubr.msk.bf16.mxu0 %vm2361_vm1, %v2360_v0 }
 0x2d9   :  { %2062 = vmatprep.subr.bf16.mxu0 %v2360_v0 }
 0x2dc   :  { %2063 = vmatpush3.bf16.msra.mxu0 %v2446_v5 }
 0x2dd   :  { %2076 = vmatprep.subr.bf16.mxu0 %v2360_v0 }
 0x2df   :  { %2065 = vmatmul.mubr.msk.bf16.vlgmr.msra.gmra.mxu0 %vm126_vm6, %v217_v44 }
 0x2e0   :  { %2077 = vmatpush3.bf16.msra.mxu0 %v2485_v37  ;;  %2080 = vmatprep.mubr.msk.bf16.mxu0 %vm2361_vm1, %v2360_v0 }
 0x2e1   :  { %2078 = vmatprep.subr.bf16.mxu0 %v2360_v0 }
 0x2e4   :  { %2079 = vmatpush3.bf16.msra.mxu0 %v2498_v39 }
 0x2e5   :  { %2092 = vmatprep.subr.bf16.mxu0 %v2360_v0 }
 0x397   :  { %v267_v50 = vpop.f32.mrf.mxu0 }
 0x398   :  { %v268_v51 = vadd.f32 %v2530_v49, %v267_v50 }
 0x399   :  { %v2050_v52 = vpop.f32.mrf.mxu0 }
 0x39a   :  { %v325_v53 = vadd.f32 %v319_v45, %v268_v51 }
 0x39b   :  { %v270_v54 = vpop.f32.mrf.mxu0 }
 0x39c   :  { %v326_v55 = vmul.f32 2.0, %v325_v53 }
 0x39d   :  { %v2051_v56 = vpop.f32.mrf.mxu0 }
 0x39e   :  { %v327_v57 = vsel %vm2464_vm5, %v326_v55, %v325_v53 }
 0x39f   :  { %v1893_v58 = vmul.f32 -1.442695, %v327_v57  ;;  %v389_v59 = vpop.f32.mrf.mxu0 }
 0x3a0   :  { %v396_v60 = vrot.slane %v389_v59, 6 }
 0x3a1   :  { %v2066_v61 = vpop.f32.mrf.mxu0  ;;  %2263 = vpow2.f32 %v1893_v58 }
 0x3a2   :  { %v398_v62 = vadd.f32 %v396_v60, %v2459_v11 }
 0x3a3   :  { %v392_v63 = vpop.f32.mrf.mxu0 }
 0x3a4   :  { %v399_v1 = vmul.f32 2.0, %v398_v62 }
 0x3a5   :  { %v2067_v2 = vpop.f32.mrf.mxu0 }
 0x3a6   :  { %v400_v4 = vsel %vm2464_vm5, %v399_v1, %v398_v62 }
 0x3a7   :  { %v1896_v6 = vmul.f32 -1.442695, %v400_v4 }
 0x3a9   :  { %2265 = vpow2.f32 %v1896_v6 }
 0x3ae   :  { %v2264_v7 = vpop.eup %2263 }
 0x3af   :  { %v331_v8 = vadd.f32 1.0, %v2264_v7 }
 0x3b1   :  { %2267 = vrcp.f32 %v331_v8 }
 0x3b6   :  { %v2266_v9 = vpop.eup %2265 }
 0x3b7   :  { %v404_v10 = vadd.f32 1.0, %v2266_v9 }
 0x3b9   :  { %2269 = vrcp.f32 %v404_v10 }
 0x3be   :  { %v2268_v12 = vpop.eup %2267 }
 0x3bf   :  { %v334_v16 = vmul.f32 2.0, %v2268_v12 }
 0x3c1   :  { %v1894_v20 = vadd.f32 -1.0, %v334_v16 }
 0x3c3   :  { %v336_v21 = vsel %vm2464_vm5, %v1894_v20, %v2268_v12 }
 0x3c4   :  { %v337_v30 = vmul.f32 0.0, %v336_v21 }
 0x3c6   :  { %v2270_v13 = vpop.eup %2269 }
 0x3c7   :  { %v407_v15 = vmul.f32 2.0, %v2270_v13 }
 0x3c9   :  { %v1897_v17 = vadd.f32 -1.0, %v407_v15 }
 0x3cb   :  { %v409_v19 = vsel %vm2464_vm5, %v1897_v17, %v2270_v13 }
 0x3cc   :  { %415 = vrot.lane.b32.xlu0 %v409_v19, %s2363_s3  ;;  %v413_v27 = vmul.f32 %v411_v26, %v409_v19 }
 0x3d0   :  { %339 = vrot.lane.b32.xlu0 %v336_v21, %s2363_s3 }
 0x43e   :  { %v416_v22 = vpop.permute.xlu0 %415 }
 0x43f   :  { %v418_v23 = vmul.f32 %v416_v22, %v409_v19 }
 0x441   :  { %420 = vrot.lane.b32.xlu1 %v418_v23, %s2364_s25 }
 0x442   :  { %v340_v24 = vpop.permute.xlu0 %339 }
 0x443   :  { %v342_v25 = vmul.f32 %v340_v24, %v336_v21 }
 0x445   :  { %344 = vrot.lane.b32.xlu1 %v342_v25, %s2364_s25 }
 0x4b3   :  { %v421_v28 = vpop.permute.xlu1 %420 }
 0x4b4   :  { %v2547_v29 = vadd.f32 %v421_v28, %v413_v27 }
 0x4b6   :  { %2271 = vtanh.f32 %v2547_v29 }
 0x4b7   :  { %v345_v31 = vpop.permute.xlu1 %344 }
 0x4b8   :  { %v2550_v32 = vadd.f32 %v345_v31, %v337_v30 }
 0x4ba   :  { %2273 = vtanh.f32 %v2550_v32 }
 0x4c3   :  { %v2272_v33 = vpop.eup %2271 }
 0x4c4   :  { %426 = vrot.lane.b32.xlu0 %v2272_v33, %s2363_s3 }
 0x4c7   :  { %v2274_v34 = vpop.eup %2273 }
 0x4c8   :  { %350 = vrot.lane.b32.xlu0 %v2274_v34, %s2363_s3  ;;  %v610_v34 = vrot.slane %v2547_v29, 6 }
 0x536   :  { %v427_v40 = vpop.permute.xlu0 %426 }
 0x537   :  { %v429_v35 = vmul.f32 %v427_v40, %v409_v19 }
 0x539   :  { %v430_v41 = vpack.c.bf16 %v429_v35, %v429_v35 }
 0x53a   :  { %v351_v42 = vpop.permute.xlu0 %350 }
 0x53b   :  { %v432_v43 = vrot.slane %v430_v41, 1  ;;  %v353_v44 = vmul.f32 %v351_v42, %v336_v21 }
 0x53d   :  { %433 = vrot.lane.b32.xlu1 %v432_v43, %s2364_s25  ;;  %v354_v45 = vpack.c.bf16 %v353_v44, %v353_v44 }
 0x541   :  { %479 = vrot.lane.b32.xlu1 %v354_v45, %s2364_s25 }
 0x5af   :  { %v434_v46 = vpop.permute.xlu1 %433 }
 0x5b0   :  { %2073 = vmatmul.mubr.msk.bf16.vlgmr.msra.gmra.mxu1 %vm126_vm6, %v434_v46 }
 0x5b1   :  { %2085 = vmatpush3.bf16.msra.mxu1 %v2433_v3  ;;  %2088 = vmatprep.mubr.msk.bf16.mxu1 %vm2361_vm1, %v2360_v0 }
 0x5b2   :  { %2086 = vmatprep.subr.bf16.mxu1 %v2360_v0 }
 0x5b3   :  { %v480_v47 = vpop.permute.xlu1 %479 }
 0x5b4   :  { %2081 = vmatmul.mubr.msk.bf16.vlgmr.msra.gmra.mxu0 %vm126_vm6, %v480_v47 }
 0x5b5   :  { %2087 = vmatpush3.bf16.msra.mxu1 %v2446_v5  ;;  %2093 = vmatpush3.bf16.msra.mxu0 %v2480_v36 }
 0x5b6   :  { %2100 = vmatprep.subr.bf16.mxu1 %v2360_v0  ;;  %2094 = vmatprep.subr.bf16.mxu0 %v2360_v0 }
 0x5b7   :  { %2096 = vmatprep.mubr.msk.bf16.mxu0 %vm2361_vm1, %v2360_v0 }
 0x5b8   :  { %2089 = vmatmul.mubr.msk.bf16.vlgmr.msra.gmra.mxu1 %vm126_vm6, %v434_v46 }
 0x5b9   :  { %2101 = vmatpush3.bf16.msra.mxu1 %v2485_v37  ;;  %2104 = vmatprep.mubr.msk.bf16.mxu1 %vm2361_vm1, %v2360_v0 }
 0x5ba   :  { %2102 = vmatprep.subr.bf16.mxu1 %v2360_v0  ;;  %2095 = vmatpush3.bf16.msra.mxu0 %v2491_v38 }
 0x5bb   :  { %2108 = vmatprep.subr.bf16.mxu0 %v2360_v0 }
 0x5bd   :  { %2103 = vmatpush3.bf16.msra.mxu1 %v2498_v39 }
 0x5be   :  { %2116 = vmatprep.subr.bf16.mxu1 %v2360_v0 }
 0x670   :  { %v472_v48 = vpop.f32.mrf.mxu1 }
 0x671   :  { %v473_v51 = vadd.f32 %v2530_v49, %v472_v48 }
 0x672   :  { %v2074_v50 = vpop.f32.mrf.mxu1 }
 0x674   :  { %v475_v52 = vpop.f32.mrf.mxu1  ;;  %v518_v53 = vpop.f32.mrf.mxu0 }
 0x675   :  { %v524_v54 = vadd.f32 %v518_v53, %v473_v51 }
 0x676   :  { %v2075_v55 = vpop.f32.mrf.mxu1  ;;  %v2082_v56 = vpop.f32.mrf.mxu0 }
 0x677   :  { %v525_v57 = vmul.f32 2.0, %v524_v54 }
 0x678   :  { %v521_v58 = vpop.f32.mrf.mxu0  ;;  %v588_v59 = vpop.f32.mrf.mxu1 }
 0x679   :  { %v526_v60 = vsel %vm2464_vm5, %v525_v57, %v524_v54  ;;  %v595_v61 = vrot.slane %v588_v59, 4 }
 0x67a   :  { %v1900_v62 = vmul.f32 -1.442695, %v526_v60  ;;  %v2083_v63 = vpop.f32.mrf.mxu0  ;;  %v2090_v1 = vpop.f32.mrf.mxu1 }
 0x67b   :  { %v597_v2 = vadd.f32 %v595_v61, %v2459_v11 }
 0x67c   :  { %2275 = vpow2.f32 %v1900_v62  ;;  %v591_v4 = vpop.f32.mrf.mxu1 }
 0x67d   :  { %v598_v6 = vmul.f32 2.0, %v597_v2 }
 0x67e   :  { %v2091_v7 = vpop.f32.mrf.mxu1 }
 0x67f   :  { %v599_v8 = vsel %vm2464_vm5, %v598_v6, %v597_v2 }
 0x680   :  { %v1903_v9 = vmul.f32 -1.442695, %v599_v8 }
 0x682   :  { %2277 = vpow2.f32 %v1903_v9 }
 0x689   :  { %v2276_v10 = vpop.eup %2275 }
 0x68a   :  { %v530_v12 = vadd.f32 1.0, %v2276_v10 }
 0x68c   :  { %2279 = vrcp.f32 %v530_v12 }
 0x68f   :  { %v2278_v13 = vpop.eup %2277 }
 0x690   :  { %v603_v15 = vadd.f32 1.0, %v2278_v13 }
 0x692   :  { %2281 = vrcp.f32 %v603_v15 }
 0x699   :  { %v2280_v16 = vpop.eup %2279 }
 0x69a   :  { %v533_v17 = vmul.f32 2.0, %v2280_v16 }
 0x69c   :  { %v1901_v19 = vadd.f32 -1.0, %v533_v17 }
 0x69e   :  { %v535_v20 = vsel %vm2464_vm5, %v1901_v19, %v2280_v16 }
 0x69f   :  { %v2282_v21 = vpop.eup %2281  ;;  %538 = vrot.lane.b32.xlu1 %v535_v20, %s2363_s3  ;;  %v536_v30 = vmul.f32 %v535_v20, %v2550_v32 }
 0x6a0   :  { %v606_v22 = vmul.f32 2.0, %v2282_v21 }
 0x6a2   :  { %v1904_v23 = vadd.f32 -1.0, %v606_v22 }
 0x6a4   :  { %v608_v24 = vsel %vm2464_vm5, %v1904_v23, %v2282_v21 }
 0x6a5   :  { %614 = vrot.lane.b32.xlu0 %v608_v24, %s2363_s3  ;;  %v612_v40 = vmul.f32 %v610_v34, %v608_v24 }
 0x711   :  { %v539_v25 = vpop.permute.xlu1 %538 }
 0x712   :  { %v541_v26 = vmul.f32 %v539_v25, %v535_v20 }
 0x714   :  { %543 = vrot.lane.b32.xlu1 %v541_v26, %s2364_s25 }
 0x717   :  { %v615_v27 = vpop.permute.xlu0 %614 }
 0x718   :  { %v617_v28 = vmul.f32 %v615_v27, %v608_v24 }
 0x71a   :  { %619 = vrot.lane.b32.xlu0 %v617_v28, %s2364_s25 }
 0x786   :  { %v544_v31 = vpop.permute.xlu1 %543 }
 0x787   :  { %v2593_v33 = vadd.f32 %v544_v31, %v536_v30 }
 0x789   :  { %2283 = vtanh.f32 %v2593_v33 }
 0x78c   :  { %v620_v35 = vpop.permute.xlu0 %619 }
 0x78d   :  { %v2597_v41 = vadd.f32 %v620_v35, %v612_v40 }
 0x78f   :  { %2285 = vtanh.f32 %v2597_v41 }
 0x796   :  { %v2284_v42 = vpop.eup %2283 }
 0x797   :  { %549 = vrot.lane.b32.xlu1 %v2284_v42, %s2363_s3  ;;  %v809_v42 = vrot.slane %v2597_v41, 6 }
 0x79c   :  { %v2286_v43 = vpop.eup %2285 }
 0x79d   :  { %625 = vrot.lane.b32.xlu0 %v2286_v43, %s2363_s3 }
 0x809   :  { %v550_v32 = vpop.permute.xlu1 %549 }
 0x80a   :  { %v552_v44 = vmul.f32 %v550_v32, %v535_v20 }
 0x80c   :  { %v553_v45 = vpack.c.bf16 %v552_v44, %v552_v44 }
 0x80e   :  { %678 = vrot.lane.b32.xlu1 %v553_v45, %s2364_s25 }
 0x80f   :  { %v626_v29 = vpop.permute.xlu0 %625 }
 0x810   :  { %v628_v46 = vmul.f32 %v626_v29, %v608_v24 }
 0x812   :  { %v629_v47 = vpack.c.bf16 %v628_v46, %v628_v46 }
 0x814   :  { %v631_v48 = vrot.slane %v629_v47, 2 }
 0x816   :  { %632 = vrot.lane.b32.xlu0 %v631_v48, %s2364_s25 }
 0x880   :  { %v679_v50 = vpop.permute.xlu1 %678 }
 0x881   :  { %2105 = vmatmul.mubr.msk.bf16.vlgmr.msra.gmra.mxu1 %vm126_vm6, %v679_v50 }
 0x882   :  { %2117 = vmatpush3.bf16.msra.mxu1 %v2480_v36  ;;  %2120 = vmatprep.mubr.msk.bf16.mxu1 %vm2361_vm1, %v2360_v0 }
 0x883   :  { %2118 = vmatprep.subr.bf16.mxu1 %v2360_v0 }
 0x886   :  { %2119 = vmatpush3.bf16.msra.mxu1 %v2491_v38 }
 0x887   :  { %2132 = vmatprep.subr.bf16.mxu1 %v2360_v0 }
 0x888   :  { %v633_v51 = vpop.permute.xlu0 %632 }
 0x889   :  { %2097 = vmatmul.mubr.msk.bf16.vlgmr.msra.gmra.mxu0 %vm126_vm6, %v633_v51 }
 0x88a   :  { %2109 = vmatpush3.bf16.msra.mxu0 %v2433_v3  ;;  %2112 = vmatprep.mubr.msk.bf16.mxu0 %vm2361_vm1, %v2360_v0 }
 0x88b   :  { %2110 = vmatprep.subr.bf16.mxu0 %v2360_v0 }
 0x88e   :  { %2111 = vmatpush3.bf16.msra.mxu0 %v2446_v5 }
 0x88f   :  { %2124 = vmatprep.subr.bf16.mxu0 %v2360_v0 }
 0x891   :  { %2113 = vmatmul.mubr.msk.bf16.vlgmr.msra.gmra.mxu0 %vm126_vm6, %v633_v51 }
 0x892   :  { %2125 = vmatpush3.bf16.msra.mxu0 %v2485_v37  ;;  %2128 = vmatprep.mubr.msk.bf16.mxu0 %vm2361_vm1, %v2360_v0 }
 0x893   :  { %2126 = vmatprep.subr.bf16.mxu0 %v2360_v0 }
 0x896   :  { %2127 = vmatpush3.bf16.msra.mxu0 %v2498_v39 }
 0x897   :  { %2140 = vmatprep.subr.bf16.mxu0 %v2360_v0 }
 0x941   :  { %v717_v52 = vpop.f32.mrf.mxu1 }
 0x943   :  { %v2106_v53 = vpop.f32.mrf.mxu1 }
 0x945   :  { %v720_v54 = vpop.f32.mrf.mxu1 }
 0x947   :  { %v2107_v55 = vpop.f32.mrf.mxu1 }
 0x949   :  { %v671_v56 = vpop.f32.mrf.mxu0 }
 0x94a   :  { %v672_v57 = vadd.f32 %v2530_v49, %v671_v56 }
 0x94b   :  { %v2098_v58 = vpop.f32.mrf.mxu0 }
 0x94c   :  { %v723_v59 = vadd.f32 %v717_v52, %v672_v57 }
 0x94d   :  { %v674_v60 = vpop.f32.mrf.mxu0 }
 0x94e   :  { %v724_v61 = vmul.f32 2.0, %v723_v59 }
 0x94f   :  { %v2099_v62 = vpop.f32.mrf.mxu0 }
 0x950   :  { %v725_v63 = vsel %vm2464_vm5, %v724_v61, %v723_v59 }
 0x951   :  { %v1907_v1 = vmul.f32 -1.442695, %v725_v63  ;;  %v787_v2 = vpop.f32.mrf.mxu0 }
 0x952   :  { %v794_v4 = vrot.slane %v787_v2, 2 }
 0x953   :  { %2287 = vpow2.f32 %v1907_v1  ;;  %v2114_v6 = vpop.f32.mrf.mxu0 }
 0x954   :  { %v796_v7 = vadd.f32 %v794_v4, %v2459_v11 }
 0x955   :  { %v790_v8 = vpop.f32.mrf.mxu0 }
 0x956   :  { %v797_v9 = vmul.f32 2.0, %v796_v7 }
 0x957   :  { %v2115_v10 = vpop.f32.mrf.mxu0 }
 0x958   :  { %v798_v12 = vsel %vm2464_vm5, %v797_v9, %v796_v7 }
 0x959   :  { %v1910_v13 = vmul.f32 -1.442695, %v798_v12 }
 0x95b   :  { %2289 = vpow2.f32 %v1910_v13 }
 0x960   :  { %v2288_v15 = vpop.eup %2287 }
 0x961   :  { %v729_v16 = vadd.f32 1.0, %v2288_v15 }
 0x963   :  { %2291 = vrcp.f32 %v729_v16 }
 0x968   :  { %v2290_v17 = vpop.eup %2289 }
 0x969   :  { %v802_v19 = vadd.f32 1.0, %v2290_v17 }
 0x96b   :  { %2293 = vrcp.f32 %v802_v19 }
 0x970   :  { %v2292_v20 = vpop.eup %2291 }
 0x971   :  { %v732_v21 = vmul.f32 2.0, %v2292_v20 }
 0x973   :  { %v1908_v22 = vadd.f32 -1.0, %v732_v21 }
 0x975   :  { %v734_v11 = vsel %vm2464_vm5, %v1908_v22, %v2292_v20 }
 0x976   :  { %737 = vrot.lane.b32.xlu1 %v734_v11, %s2363_s3  ;;  %v735_v34 = vmul.f32 %v734_v11, %v2593_v33 }
 0x978   :  { %v2294_v23 = vpop.eup %2293 }
 0x979   :  { %v805_v24 = vmul.f32 2.0, %v2294_v23 }
 0x97b   :  { %v1911_v25 = vadd.f32 -1.0, %v805_v24 }
 0x97d   :  { %v807_v26 = vsel %vm2464_vm5, %v1911_v25, %v2294_v23 }
 0x97e   :  { %813 = vrot.lane.b32.xlu0 %v807_v26, %s2363_s3  ;;  %v811_v43 = vmul.f32 %v809_v42, %v807_v26 }
 0x9e8   :  { %v738_v27 = vpop.permute.xlu1 %737 }
 0x9e9   :  { %v740_v28 = vmul.f32 %v738_v27, %v734_v11 }
 0x9eb   :  { %742 = vrot.lane.b32.xlu1 %v740_v28, %s2364_s25 }
 0x9f0   :  { %v814_v30 = vpop.permute.xlu0 %813 }
 0x9f1   :  { %v816_v31 = vmul.f32 %v814_v30, %v807_v26 }
 0x9f3   :  { %818 = vrot.lane.b32.xlu0 %v816_v31, %s2364_s25 }
 0xa5d   :  { %v743_v40 = vpop.permute.xlu1 %742 }
 0xa5e   :  { %v2640_v35 = vadd.f32 %v743_v40, %v735_v34 }
 0xa60   :  { %2295 = vtanh.f32 %v2640_v35 }
 0xa65   :  { %v819_v32 = vpop.permute.xlu0 %818 }
 0xa66   :  { %v2644_v44 = vadd.f32 %v819_v32, %v811_v43 }
 0xa68   :  { %2297 = vtanh.f32 %v2644_v44  ;;  %v1005_v32 = vrot.slane %v2644_v44, 6 }
 0xa6d   :  { %v2296_v45 = vpop.eup %2295 }
 0xa6e   :  { %748 = vrot.lane.b32.xlu1 %v2296_v45, %s2363_s3 }
 0xa75   :  { %v2298_v29 = vpop.eup %2297 }
 0xa76   :  { %824 = vrot.lane.b32.xlu0 %v2298_v29, %s2363_s3 }
 0xae0   :  { %v749_v33 = vpop.permute.xlu1 %748 }
 0xae1   :  { %v751_v46 = vmul.f32 %v749_v33, %v734_v11 }
 0xae3   :  { %v752_v47 = vpack.c.bf16 %v751_v46, %v751_v46 }
 0xae5   :  { %877 = vrot.lane.b32.xlu1 %v752_v47, %s2364_s25 }
 0xae8   :  { %v825_v48 = vpop.permute.xlu0 %824 }
 0xae9   :  { %v827_v50 = vmul.f32 %v825_v48, %v807_v26 }
 0xaeb   :  { %v828_v41 = vpack.c.bf16 %v827_v50, %v827_v50 }
 0xaed   :  { %v830_v51 = vrot.slane %v828_v41, 3 }
 0xaef   :  { %831 = vrot.lane.b32.xlu0 %v830_v51, %s2364_s25 }
 0xb57   :  { %v878_v52 = vpop.permute.xlu1 %877 }
 0xb58   :  { %2129 = vmatmul.mubr.msk.bf16.vlgmr.msra.gmra.mxu0 %vm126_vm6, %v878_v52 }
 0xb59   :  { %2141 = vmatpush3.bf16.msra.mxu0 %v2480_v36  ;;  %2144 = vmatprep.mubr.msk.bf16.mxu0 %vm2361_vm1, %v2360_v0 }
 0xb5a   :  { %2142 = vmatprep.subr.bf16.mxu0 %v2360_v0 }
 0xb5d   :  { %2143 = vmatpush3.bf16.msra.mxu0 %v2491_v38 }
 0xb5e   :  { %2156 = vmatprep.subr.bf16.mxu0 %v2360_v0 }
 0xb61   :  { %v832_v53 = vpop.permute.xlu0 %831 }
 0xb62   :  { %2121 = vmatmul.mubr.msk.bf16.vlgmr.msra.gmra.mxu1 %vm126_vm6, %v832_v53 }
 0xb63   :  { %2133 = vmatpush3.bf16.msra.mxu1 %v2433_v3  ;;  %2136 = vmatprep.mubr.msk.bf16.mxu1 %vm2361_vm1, %v2360_v0 }
 0xb64   :  { %2134 = vmatprep.subr.bf16.mxu1 %v2360_v0 }
 0xb67   :  { %2135 = vmatpush3.bf16.msra.mxu1 %v2446_v5 }
 0xb68   :  { %2148 = vmatprep.subr.bf16.mxu1 %v2360_v0 }
 0xb6a   :  { %2137 = vmatmul.mubr.msk.bf16.vlgmr.msra.gmra.mxu1 %vm126_vm6, %v832_v53 }
 0xb6b   :  { %2149 = vmatpush3.bf16.msra.mxu1 %v2485_v37  ;;  %2152 = vmatprep.mubr.msk.bf16.mxu1 %vm2361_vm1, %v2360_v0 }
 0xb6c   :  { %2150 = vmatprep.subr.bf16.mxu1 %v2360_v0 }
 0xb6f   :  { %2151 = vmatpush3.bf16.msra.mxu1 %v2498_v39 }
 0xb70   :  { %2164 = vmatprep.subr.bf16.mxu1 %v2360_v0 }
 0xc18   :  { %v916_v54 = vpop.f32.mrf.mxu0 }
 0xc1a   :  { %v2130_v55 = vpop.f32.mrf.mxu0 }
 0xc1c   :  { %v919_v56 = vpop.f32.mrf.mxu0 }
 0xc1e   :  { %v2131_v57 = vpop.f32.mrf.mxu0 }
 0xc22   :  { %v870_v58 = vpop.f32.mrf.mxu1 }
 0xc23   :  { %v871_v59 = vadd.f32 %v2530_v49, %v870_v58 }
 0xc24   :  { %v2122_v60 = vpop.f32.mrf.mxu1 }
 0xc25   :  { %v922_v61 = vadd.f32 %v916_v54, %v871_v59 }
 0xc26   :  { %v873_v62 = vpop.f32.mrf.mxu1 }
 0xc27   :  { %v923_v63 = vmul.f32 2.0, %v922_v61 }
 0xc28   :  { %v2123_v1 = vpop.f32.mrf.mxu1 }
 0xc29   :  { %v924_v2 = vsel %vm2464_vm5, %v923_v63, %v922_v61 }
 0xc2a   :  { %v1914_v4 = vmul.f32 -1.442695, %v924_v2  ;;  %v986_v6 = vpop.f32.mrf.mxu1 }
 0xc2b   :  { %v992_v7 = vadd.f32 %v986_v6, %v2461_v14 }
 0xc2c   :  { %2299 = vpow2.f32 %v1914_v4  ;;  %v2138_v8 = vpop.f32.mrf.mxu1 }
 0xc2d   :  { %v993_v9 = vmul.f32 2.0, %v992_v7 }
 0xc2e   :  { %v989_v10 = vpop.f32.mrf.mxu1 }
 0xc2f   :  { %v994_v12 = vsel %vm2464_vm5, %v993_v9, %v992_v7 }
 0xc30   :  { %v1917_v13 = vmul.f32 -1.442695, %v994_v12  ;;  %v2139_v15 = vpop.f32.mrf.mxu1 }
 0xc32   :  { %2301 = vpow2.f32 %v1917_v13 }
 0xc39   :  { %v2300_v16 = vpop.eup %2299 }
 0xc3a   :  { %v928_v17 = vadd.f32 1.0, %v2300_v16 }
 0xc3c   :  { %2303 = vrcp.f32 %v928_v17 }
 0xc3f   :  { %v2302_v19 = vpop.eup %2301 }
 0xc40   :  { %v998_v20 = vadd.f32 1.0, %v2302_v19 }
 0xc42   :  { %2305 = vrcp.f32 %v998_v20 }
 0xc49   :  { %v2304_v21 = vpop.eup %2303 }
 0xc4a   :  { %v931_v22 = vmul.f32 2.0, %v2304_v21 }
 0xc4c   :  { %v1915_v11 = vadd.f32 -1.0, %v931_v22 }
 0xc4e   :  { %v933_v23 = vsel %vm2464_vm5, %v1915_v11, %v2304_v21 }
 0xc4f   :  { %v2306_v24 = vpop.eup %2305  ;;  %936 = vrot.lane.b32.xlu1 %v933_v23, %s2363_s3  ;;  %v934_v40 = vmul.f32 %v933_v23, %v2640_v35 }
 0xc50   :  { %v1001_v25 = vmul.f32 2.0, %v2306_v24 }
 0xc52   :  { %v1918_v26 = vadd.f32 -1.0, %v1001_v25 }
 0xc54   :  { %v1003_v27 = vsel %vm2464_vm5, %v1918_v26, %v2306_v24 }
 0xc55   :  { %1009 = vrot.lane.b32.xlu0 %v1003_v27, %s2363_s3  ;;  %v1007_v45 = vmul.f32 %v1005_v32, %v1003_v27 }
 0xcc1   :  { %v937_v28 = vpop.permute.xlu1 %936 }
 0xcc2   :  { %v939_v30 = vmul.f32 %v937_v28, %v933_v23 }
 0xcc4   :  { %941 = vrot.lane.b32.xlu1 %v939_v30, %s2364_s25 }
 0xcc7   :  { %v1010_v31 = vpop.permute.xlu0 %1009 }
 0xcc8   :  { %v1012_v34 = vmul.f32 %v1010_v31, %v1003_v27 }
 0xcca   :  { %1014 = vrot.lane.b32.xlu0 %v1012_v34, %s2364_s25 }
 0xd36   :  { %v942_v42 = vpop.permute.xlu1 %941 }
 0xd37   :  { %v2687_v43 = vadd.f32 %v942_v42, %v934_v40 }
 0xd39   :  { %2307 = vtanh.f32 %v2687_v43 }
 0xd3c   :  { %v1015_v29 = vpop.permute.xlu0 %1014 }
 0xd3d   :  { %v2691_v33 = vadd.f32 %v1015_v29, %v1007_v45 }
 0xd3f   :  { %2309 = vtanh.f32 %v2691_v33  ;;  %v1203_v32 = vrot.slane %v2691_v33, 6 }
 0xd46   :  { %v2308_v46 = vpop.eup %2307 }
 0xd47   :  { %947 = vrot.lane.b32.xlu1 %v2308_v46, %s2363_s3 }
 0xd4c   :  { %v2310_v47 = vpop.eup %2309 }
 0xd4d   :  { %1020 = vrot.lane.b32.xlu0 %v2310_v47, %s2363_s3 }
 0xdb9   :  { %v948_v35 = vpop.permute.xlu1 %947 }
 0xdba   :  { %v950_v48 = vmul.f32 %v948_v35, %v933_v23 }
 0xdbc   :  { %v951_v50 = vpack.c.bf16 %v950_v48, %v950_v48 }
 0xdbe   :  { %1072 = vrot.lane.b32.xlu1 %v951_v50, %s2364_s25 }
 0xdbf   :  { %v1021_v44 = vpop.permute.xlu0 %1020 }
 0xdc0   :  { %v1023_v41 = vmul.f32 %v1021_v44, %v1003_v27 }
 0xdc2   :  { %v1024_v51 = vpack.c.bf16 %v1023_v41, %v1023_v41 }
 0xdc4   :  { %1026 = vrot.lane.b32.xlu0 %v1024_v51, %s2364_s25 }
 0xe30   :  { %v1073_v52 = vpop.permute.xlu1 %1072 }
 0xe31   :  { %2153 = vmatmul.mubr.msk.bf16.vlgmr.msra.gmra.mxu1 %vm126_vm6, %v1073_v52 }
 0xe32   :  { %2165 = vmatpush3.bf16.msra.mxu1 %v2480_v36  ;;  %2168 = vmatprep.mubr.msk.bf16.mxu1 %vm2361_vm1, %v2360_v0 }
 0xe33   :  { %2166 = vmatprep.subr.bf16.mxu1 %v2360_v0 }
 0xe36   :  { %v1027_v53 = vpop.permute.xlu0 %1026  ;;  %2167 = vmatpush3.bf16.msra.mxu1 %v2491_v38 }
 0xe37   :  { %2145 = vmatmul.mubr.msk.bf16.vlgmr.msra.gmra.mxu0 %vm126_vm6, %v1027_v53  ;;  %2180 = vmatprep.subr.bf16.mxu1 %v2360_v0 }
 0xe38   :  { %2157 = vmatpush3.bf16.msra.mxu0 %v2433_v3  ;;  %2160 = vmatprep.mubr.msk.bf16.mxu0 %vm2361_vm1, %v2360_v0 }
 0xe39   :  { %2158 = vmatprep.subr.bf16.mxu0 %v2360_v0 }
 0xe3c   :  { %2159 = vmatpush3.bf16.msra.mxu0 %v2446_v5 }
 0xe3d   :  { %2172 = vmatprep.subr.bf16.mxu0 %v2360_v0 }
 0xe3f   :  { %2161 = vmatmul.mubr.msk.bf16.vlgmr.msra.gmra.mxu0 %vm126_vm6, %v1027_v53 }
 0xe40   :  { %2173 = vmatpush3.bf16.msra.mxu0 %v2485_v37  ;;  %2176 = vmatprep.mubr.msk.bf16.mxu0 %vm2361_vm1, %v2360_v0 }
 0xe41   :  { %2174 = vmatprep.subr.bf16.mxu0 %v2360_v0 }
 0xe44   :  { %2175 = vmatpush3.bf16.msra.mxu0 %v2498_v39 }
 0xe45   :  { %2188 = vmatprep.subr.bf16.mxu0 %v2360_v0 }
 0xef1   :  { %v1111_v3 = vpop.f32.mrf.mxu1 }
 0xef3   :  { %v2154_v54 = vpop.f32.mrf.mxu1 }
 0xef5   :  { %v1114_v55 = vpop.f32.mrf.mxu1 }
 0xef7   :  { %v1065_v56 = vpop.f32.mrf.mxu0  ;;  %v2155_v5 = vpop.f32.mrf.mxu1 }
 0xef8   :  { %v1066_v57 = vadd.f32 %v2530_v49, %v1065_v56 }
 0xef9   :  { %v2146_v58 = vpop.f32.mrf.mxu0 }
 0xefa   :  { %v1117_v59 = vadd.f32 %v1111_v3, %v1066_v57  ;;  %v2756_v3 = vld [vmem:[%s2892_s2 + $0x8] sm:$0xff]  }
 0xefb   :  { %v1068_v60 = vpop.f32.mrf.mxu0 }
 0xefc   :  { %v1118_v61 = vmul.f32 2.0, %v1117_v59 }
 0xefd   :  { %v2147_v62 = vpop.f32.mrf.mxu0 }
 0xefe   :  { %v1119_v63 = vsel %vm2464_vm5, %v1118_v61, %v1117_v59 }
 0xeff   :  { %v1921_v1 = vmul.f32 -1.442695, %v1119_v63  ;;  %v1181_v2 = vpop.f32.mrf.mxu0 }
 0xf00   :  { %v1188_v4 = vrot.slane %v1181_v2, 6 }
 0xf01   :  { %2311 = vpow2.f32 %v1921_v1  ;;  %v2162_v6 = vpop.f32.mrf.mxu0 }
 0xf02   :  { %v1190_v7 = vadd.f32 %v1188_v4, %v2461_v14 }
 0xf03   :  { %v1184_v8 = vpop.f32.mrf.mxu0 }
 0xf04   :  { %v1191_v9 = vmul.f32 2.0, %v1190_v7 }
 0xf05   :  { %v2163_v10 = vpop.f32.mrf.mxu0 }
 0xf06   :  { %v1192_v12 = vsel %vm2464_vm5, %v1191_v9, %v1190_v7 }
 0xf07   :  { %v1924_v13 = vmul.f32 -1.442695, %v1192_v12 }
 0xf09   :  { %2313 = vpow2.f32 %v1924_v13 }
 0xf0e   :  { %v2312_v15 = vpop.eup %2311 }
 0xf0f   :  { %v1123_v16 = vadd.f32 1.0, %v2312_v15 }
 0xf11   :  { %2315 = vrcp.f32 %v1123_v16 }
 0xf16   :  { %v2314_v17 = vpop.eup %2313 }
 0xf17   :  { %v1196_v19 = vadd.f32 1.0, %v2314_v17 }
 0xf19   :  { %2317 = vrcp.f32 %v1196_v19 }
 0xf1e   :  { %v2316_v20 = vpop.eup %2315 }
 0xf1f   :  { %v1126_v21 = vmul.f32 2.0, %v2316_v20 }
 0xf21   :  { %v1922_v22 = vadd.f32 -1.0, %v1126_v21 }
 0xf23   :  { %v1128_v11 = vsel %vm2464_vm5, %v1922_v22, %v2316_v20 }
 0xf24   :  { %1131 = vrot.lane.b32.xlu1 %v1128_v11, %s2363_s3  ;;  %v1129_v34 = vmul.f32 %v1128_v11, %v2687_v43 }
 0xf26   :  { %v2318_v23 = vpop.eup %2317 }
 0xf27   :  { %v1199_v24 = vmul.f32 2.0, %v2318_v23 }
 0xf29   :  { %v1925_v25 = vadd.f32 -1.0, %v1199_v24 }
 0xf2b   :  { %v1201_v26 = vsel %vm2464_vm5, %v1925_v25, %v2318_v23 }
 0xf2c   :  { %1207 = vrot.lane.b32.xlu0 %v1201_v26, %s2363_s3  ;;  %v1205_v45 = vmul.f32 %v1203_v32, %v1201_v26 }
 0xf96   :  { %v1132_v27 = vpop.permute.xlu1 %1131 }
 0xf97   :  { %v1134_v28 = vmul.f32 %v1132_v27, %v1128_v11 }
 0xf99   :  { %1136 = vrot.lane.b32.xlu1 %v1134_v28, %s2364_s25 }
 0xf9e   :  { %v1208_v30 = vpop.permute.xlu0 %1207 }
 0xf9f   :  { %v1210_v31 = vmul.f32 %v1208_v30, %v1201_v26 }
 0xfa1   :  { %1212 = vrot.lane.b32.xlu0 %v1210_v31, %s2364_s25 }
0x100b   :  { %v1137_v40 = vpop.permute.xlu1 %1136 }
0x100c   :  { %v2734_v42 = vadd.f32 %v1137_v40, %v1129_v34 }
0x100e   :  { %2319 = vtanh.f32 %v2734_v42 }
0x1013   :  { %v1213_v29 = vpop.permute.xlu0 %1212 }
0x1014   :  { %v2738_v46 = vadd.f32 %v1213_v29, %v1205_v45 }
0x1016   :  { %2321 = vtanh.f32 %v2738_v46  ;;  %v1402_v34 = vrot.slane %v2738_v46, 6 }
0x101b   :  { %v2320_v47 = vpop.eup %2319 }
0x101c   :  { %1142 = vrot.lane.b32.xlu1 %v2320_v47, %s2363_s3 }
0x1023   :  { %v2322_v35 = vpop.eup %2321 }
0x1024   :  { %1218 = vrot.lane.b32.xlu0 %v2322_v35, %s2363_s3 }
0x108e   :  { %v1143_v43 = vpop.permute.xlu1 %1142 }
0x108f   :  { %v1145_v48 = vmul.f32 %v1143_v43, %v1128_v11 }
0x1091   :  { %v1146_v50 = vpack.c.bf16 %v1145_v48, %v1145_v48 }
0x1093   :  { %1271 = vrot.lane.b32.xlu1 %v1146_v50, %s2364_s25 }
0x1096   :  { %v1219_v44 = vpop.permute.xlu0 %1218 }
0x1097   :  { %v1221_v41 = vmul.f32 %v1219_v44, %v1201_v26 }
0x1099   :  { %v1222_v33 = vpack.c.bf16 %v1221_v41, %v1221_v41 }
0x109b   :  { %v1224_v51 = vrot.slane %v1222_v33, 1  ;;  %v2355_v33 = vld [vmem:[%s2895_s4 + $0x8] sm:$0xff]  }
0x109d   :  { %1225 = vrot.lane.b32.xlu0 %v1224_v51, %s2364_s25  ;;  %v2356_v51 = vld [vmem:[%s2895_s4] sm:$0xff]  }
0x1105   :  { %v1272_v52 = vpop.permute.xlu1 %1271 }
0x1106   :  { %2177 = vmatmul.mubr.msk.bf16.vlgmr.msra.gmra.mxu0 %vm126_vm6, %v1272_v52 }
0x1107   :  { %2189 = vmatpush3.bf16.msra.mxu0 %v2480_v36  ;;  %2192 = vmatprep.mubr.msk.bf16.mxu0 %vm2361_vm1, %v2360_v0  ;;  %v2765_v36 = vld [vmem:[%s2892_s2] sm:$0xff]  }
0x1108   :  { %2190 = vmatprep.subr.bf16.mxu0 %v2360_v0 }
0x110b   :  { %2191 = vmatpush3.bf16.msra.mxu0 %v2491_v38 }
0x110c   :  { %2204 = vmatprep.subr.bf16.mxu0 %v2360_v0 }
0x110f   :  { %v1226_v53 = vpop.permute.xlu0 %1225 }
0x1110   :  { %2169 = vmatmul.mubr.msk.bf16.vlgmr.msra.gmra.mxu1 %vm126_vm6, %v1226_v53 }
0x1111   :  { %2181 = vmatpush3.bf16.msra.mxu1 %v2756_v3  ;;  %2184 = vmatprep.mubr.msk.bf16.mxu1 %vm2361_vm1, %v2360_v0 }
0x1112   :  { %2182 = vmatprep.subr.bf16.mxu1 %v2360_v0 }
0x1115   :  { %2183 = vmatpush3.bf16.msra.mxu1 %v2765_v36 }
0x1116   :  { %2196 = vmatprep.subr.bf16.mxu1 %v2360_v0 }
0x1118   :  { %2185 = vmatmul.mubr.msk.bf16.vlgmr.msra.gmra.mxu1 %vm126_vm6, %v1226_v53  ;;  %v2357_v53 = vld [vmem:[%s2896_s5 + $0x8] sm:$0xff]  }
0x1119   :  { %2197 = vmatpush3.bf16.msra.mxu1 %v2485_v37  ;;  %2200 = vmatprep.mubr.msk.bf16.mxu1 %vm2361_vm1, %v2360_v0 }
0x111a   :  { %2198 = vmatprep.subr.bf16.mxu1 %v2360_v0 }
0x111d   :  { %2199 = vmatpush3.bf16.msra.mxu1 %v2498_v39 }
0x111e   :  { %2212 = vmatprep.subr.bf16.mxu1 %v2360_v0 }
0x11c6   :  { %v1310_v38 = vpop.f32.mrf.mxu0 }
0x11c8   :  { %v2178_v54 = vpop.f32.mrf.mxu0 }
0x11ca   :  { %v1313_v55 = vpop.f32.mrf.mxu0 }
0x11cc   :  { %v2179_v56 = vpop.f32.mrf.mxu0 }
0x11d0   :  { %v1264_v5 = vpop.f32.mrf.mxu1 }
0x11d1   :  { %v1265_v57 = vadd.f32 %v2530_v49, %v1264_v5  ;;  %v2834_v5 = vld [vmem:[%s2897_s6] ss:$0 sm:$0xff] }
0x11d2   :  { %v2170_v58 = vpop.f32.mrf.mxu1 }
0x11d3   :  { %v1316_v59 = vadd.f32 %v1310_v38, %v1265_v57 }
0x11d4   :  { %v1267_v60 = vpop.f32.mrf.mxu1 }
0x11d5   :  { %v1317_v37 = vmul.f32 2.0, %v1316_v59 }
0x11d6   :  { %v2171_v61 = vpop.f32.mrf.mxu1 }
0x11d7   :  { %v1318_v62 = vsel %vm2464_vm5, %v1317_v37, %v1316_v59 }
0x11d8   :  { %v1928_v63 = vmul.f32 -1.442695, %v1318_v62  ;;  %v1380_v1 = vpop.f32.mrf.mxu1 }
0x11d9   :  { %v1387_v39 = vrot.slane %v1380_v1, 4 }
0x11da   :  { %2323 = vpow2.f32 %v1928_v63  ;;  %v2186_v2 = vpop.f32.mrf.mxu1 }
0x11db   :  { %v1389_v4 = vadd.f32 %v1387_v39, %v2461_v14 }
0x11dc   :  { %v1383_v6 = vpop.f32.mrf.mxu1 }
0x11dd   :  { %v1390_v7 = vmul.f32 2.0, %v1389_v4 }
0x11de   :  { %v2187_v8 = vpop.f32.mrf.mxu1 }
0x11df   :  { %v1391_v49 = vsel %vm2464_vm5, %v1390_v7, %v1389_v4 }
0x11e0   :  { %v1931_v9 = vmul.f32 -1.442695, %v1391_v49 }
0x11e2   :  { %2325 = vpow2.f32 %v1931_v9 }
0x11e7   :  { %v2324_v10 = vpop.eup %2323 }
0x11e8   :  { %v1322_v12 = vadd.f32 1.0, %v2324_v10 }
0x11ea   :  { %2327 = vrcp.f32 %v1322_v12 }
0x11ef   :  { %v2326_v13 = vpop.eup %2325 }
0x11f0   :  { %v1395_v15 = vadd.f32 1.0, %v2326_v13 }
0x11f2   :  { %2329 = vrcp.f32 %v1395_v15 }
0x11f7   :  { %v2328_v16 = vpop.eup %2327 }
0x11f8   :  { %v1325_v17 = vmul.f32 2.0, %v2328_v16 }
0x11fa   :  { %v1929_v19 = vadd.f32 -1.0, %v1325_v17 }
0x11fc   :  { %v1327_v20 = vsel %vm2464_vm5, %v1929_v19, %v2328_v16 }
0x11fd   :  { %1330 = vrot.lane.b32.xlu1 %v1327_v20, %s2363_s3  ;;  %v1328_v28 = vmul.f32 %v1327_v20, %v2734_v42 }
0x11ff   :  { %v2330_v21 = vpop.eup %2329 }
0x1200   :  { %v1398_v22 = vmul.f32 2.0, %v2330_v21 }
0x1202   :  { %v1932_v11 = vadd.f32 -1.0, %v1398_v22 }
0x1204   :  { %v1400_v23 = vsel %vm2464_vm5, %v1932_v11, %v2330_v21 }
0x1205   :  { %1406 = vrot.lane.b32.xlu0 %v1400_v23, %s2363_s3  ;;  %v1404_v40 = vmul.f32 %v1402_v34, %v1400_v23 }
0x126f   :  { %v1331_v24 = vpop.permute.xlu1 %1330 }
0x1270   :  { %v1333_v25 = vmul.f32 %v1331_v24, %v1327_v20 }
0x1272   :  { %1335 = vrot.lane.b32.xlu1 %v1333_v25, %s2364_s25 }
0x1277   :  { %v1407_v26 = vpop.permute.xlu0 %1406 }
0x1278   :  { %v1409_v27 = vmul.f32 %v1407_v26, %v1400_v23 }
0x127a   :  { %1411 = vrot.lane.b32.xlu0 %v1409_v27, %s2364_s25 }
0x12e4   :  { %v1336_v30 = vpop.permute.xlu1 %1335 }
0x12e5   :  { %v2791_v31 = vadd.f32 %v1336_v30, %v1328_v28 }
0x12e7   :  { %2331 = vtanh.f32 %v2791_v31 }
0x12ec   :  { %v1412_v32 = vpop.permute.xlu0 %1411 }
0x12ed   :  { %v2795_v45 = vadd.f32 %v1412_v32, %v1404_v40 }
0x12ef   :  { %2333 = vtanh.f32 %v2795_v45  ;;  %v1601_v34 = vrot.slane %v2795_v45, 6 }
0x12f4   :  { %v2332_v29 = vpop.eup %2331 }
0x12f5   :  { %1341 = vrot.lane.b32.xlu1 %v2332_v29, %s2363_s3 }
0x12fc   :  { %v2334_v47 = vpop.eup %2333 }
0x12fd   :  { %1417 = vrot.lane.b32.xlu0 %v2334_v47, %s2363_s3 }
0x1367   :  { %v1342_v42 = vpop.permute.xlu1 %1341 }
0x1368   :  { %v1344_v35 = vmul.f32 %v1342_v42, %v1327_v20 }
0x136a   :  { %v1345_v43 = vpack.c.bf16 %v1344_v35, %v1344_v35 }
0x136c   :  { %1470 = vrot.lane.b32.xlu1 %v1345_v43, %s2364_s25 }
0x136f   :  { %v1418_v48 = vpop.permute.xlu0 %1417 }
0x1370   :  { %v1420_v50 = vmul.f32 %v1418_v48, %v1400_v23 }
0x1372   :  { %v1421_v46 = vpack.c.bf16 %v1420_v50, %v1420_v50 }
0x1374   :  { %v1423_v44 = vrot.slane %v1421_v46, 2 }
0x1376   :  { %1424 = vrot.lane.b32.xlu0 %v1423_v44, %s2364_s25 }
0x13de   :  { %v1471_v41 = vpop.permute.xlu1 %1470 }
0x13df   :  { %2201 = vmatmul.mubr.msk.bf16.vlgmr.msra.gmra.mxu1 %vm126_vm6, %v1471_v41 }
0x13e0   :  { %2213 = vmatpush3.bf16.msra.mxu1 %v2355_v33  ;;  %2216 = vmatprep.mubr.msk.bf16.mxu1 %vm2361_vm1, %v2360_v0 }
0x13e1   :  { %2214 = vmatprep.subr.bf16.mxu1 %v2360_v0 }
0x13e4   :  { %2215 = vmatpush3.bf16.msra.mxu1 %v2356_v51 }
0x13e5   :  { %2228 = vmatprep.subr.bf16.mxu1 %v2360_v0 }
0x13e8   :  { %v1425_v52 = vpop.permute.xlu0 %1424 }
0x13e9   :  { %2193 = vmatmul.mubr.msk.bf16.vlgmr.msra.gmra.mxu0 %vm126_vm6, %v1425_v52 }
0x13ea   :  { %2205 = vmatpush3.bf16.msra.mxu0 %v2756_v3  ;;  %2208 = vmatprep.mubr.msk.bf16.mxu0 %vm2361_vm1, %v2360_v0  ;;  %v2358_v3 = vld [vmem:[%s2896_s5] sm:$0xff]  }
0x13eb   :  { %2206 = vmatprep.subr.bf16.mxu0 %v2360_v0 }
0x13ee   :  { %2207 = vmatpush3.bf16.msra.mxu0 %v2765_v36 }
0x13ef   :  { %2220 = vmatprep.subr.bf16.mxu0 %v2360_v0 }
0x13f1   :  { %2209 = vmatmul.mubr.msk.bf16.vlgmr.msra.gmra.mxu0 %vm126_vm6, %v1425_v52 }
0x13f2   :  { %2221 = vmatpush3.bf16.msra.mxu0 %v2357_v53  ;;  %2224 = vmatprep.mubr.msk.bf16.mxu0 %vm2361_vm1, %v2360_v0 }
0x13f3   :  { %2222 = vmatprep.subr.bf16.mxu0 %v2360_v0 }
0x13f6   :  { %2223 = vmatpush3.bf16.msra.mxu0 %v2358_v3 }
0x13f7   :  { %2236 = vmatprep.subr.bf16.mxu0 %v2360_v0 }
0x149f   :  { %v1509_v36 = vpop.f32.mrf.mxu1 }
0x14a1   :  { %v2202_v38 = vpop.f32.mrf.mxu1 }
0x14a3   :  { %v1512_v54 = vpop.f32.mrf.mxu1 }
0x14a5   :  { %v2203_v55 = vpop.f32.mrf.mxu1 }
0x14a9   :  { %v1463_v56 = vpop.f32.mrf.mxu0 }
0x14aa   :  { %v1464_v57 = vadd.f32 %v2834_v5, %v1463_v56 }
0x14ab   :  { %v2194_v58 = vpop.f32.mrf.mxu0 }
0x14ac   :  { %v1515_v59 = vadd.f32 %v1509_v36, %v1464_v57 }
0x14ad   :  { %v1466_v60 = vpop.f32.mrf.mxu0 }
0x14ae   :  { %v1516_v37 = vmul.f32 2.0, %v1515_v59 }
0x14af   :  { %v2195_v61 = vpop.f32.mrf.mxu0 }
0x14b0   :  { %v1517_v62 = vsel %vm2464_vm5, %v1516_v37, %v1515_v59 }
0x14b1   :  { %v1935_v63 = vmul.f32 -1.442695, %v1517_v62  ;;  %v1579_v1 = vpop.f32.mrf.mxu0 }
0x14b2   :  { %v1586_v39 = vrot.slane %v1579_v1, 2 }
0x14b3   :  { %2335 = vpow2.f32 %v1935_v63  ;;  %v2210_v2 = vpop.f32.mrf.mxu0 }
0x14b4   :  { %v1588_v4 = vadd.f32 %v1586_v39, %v2461_v14 }
0x14b5   :  { %v1582_v6 = vpop.f32.mrf.mxu0 }
0x14b6   :  { %v1589_v7 = vmul.f32 2.0, %v1588_v4 }
0x14b7   :  { %v2211_v8 = vpop.f32.mrf.mxu0 }
0x14b8   :  { %v1590_v49 = vsel %vm2464_vm5, %v1589_v7, %v1588_v4  ;;  %v2254_v7 = vld [vmem:[%s2898_s7 + $0x8] sm:$0xff]  }
0x14b9   :  { %v1938_v9 = vmul.f32 -1.442695, %v1590_v49  ;;  %v2256_v49 = vld [vmem:[%s2899_s9] sm:$0xff]  }
0x14bb   :  { %2337 = vpow2.f32 %v1938_v9 }
0x14c0   :  { %v2336_v10 = vpop.eup %2335 }
0x14c1   :  { %v1521_v12 = vadd.f32 1.0, %v2336_v10 }
0x14c3   :  { %2339 = vrcp.f32 %v1521_v12 }
0x14c8   :  { %v2338_v13 = vpop.eup %2337 }
0x14c9   :  { %v1594_v15 = vadd.f32 1.0, %v2338_v13 }
0x14cb   :  { %2341 = vrcp.f32 %v1594_v15  ;;  %v1944_v15 = vld [vmem:[%s2901_s8] ss:$0 sm:$0xff] }
0x14d0   :  { %v2340_v16 = vpop.eup %2339 }
0x14d1   :  { %v1524_v17 = vmul.f32 2.0, %v2340_v16 }
0x14d3   :  { %v1936_v19 = vadd.f32 -1.0, %v1524_v17 }
0x14d5   :  { %v1526_v14 = vsel %vm2464_vm5, %v1936_v19, %v2340_v16 }
0x14d6   :  { %1529 = vrot.lane.b32.xlu1 %v1526_v14, %s2363_s3  ;;  %v1527_v27 = vmul.f32 %v1526_v14, %v2791_v31 }
0x14d8   :  { %v2342_v20 = vpop.eup %2341 }
0x14d9   :  { %v1597_v21 = vmul.f32 2.0, %v2342_v20 }
0x14db   :  { %v1939_v22 = vadd.f32 -1.0, %v1597_v21 }
0x14dd   :  { %v1599_v11 = vsel %vm2464_vm5, %v1939_v22, %v2342_v20 }
0x14de   :  { %1605 = vrot.lane.b32.xlu0 %v1599_v11, %s2363_s3  ;;  %v1603_v40 = vmul.f32 %v1601_v34, %v1599_v11 }
0x1548   :  { %v1530_v23 = vpop.permute.xlu1 %1529 }
0x1549   :  { %v1532_v24 = vmul.f32 %v1530_v23, %v1526_v14 }
0x154b   :  { %1534 = vrot.lane.b32.xlu1 %v1532_v24, %s2364_s25 }
0x1550   :  { %v1606_v25 = vpop.permute.xlu0 %1605 }
0x1551   :  { %v1608_v26 = vmul.f32 %v1606_v25, %v1599_v11 }
0x1553   :  { %1610 = vrot.lane.b32.xlu0 %v1608_v26, %s2364_s25 }
0x15bd   :  { %v1535_v28 = vpop.permute.xlu1 %1534 }
0x15be   :  { %v1537_v30 = vadd.f32 %v1535_v28, %v1527_v27 }
0x15c0   :  { %2343 = vtanh.f32 %v1537_v30 }
0x15c5   :  { %v1611_v32 = vpop.permute.xlu0 %1610 }
0x15c6   :  { %v1613_v29 = vadd.f32 %v1611_v32, %v1603_v40 }
0x15c8   :  { %2345 = vtanh.f32 %v1613_v29 }
0x15cd   :  { %v2344_v47 = vpop.eup %2343 }
0x15ce   :  { %1540 = vrot.lane.b32.xlu1 %v2344_v47, %s2363_s3 }
0x15d5   :  { %v2346_v42 = vpop.eup %2345 }
0x15d6   :  { %1616 = vrot.lane.b32.xlu0 %v2346_v42, %s2363_s3 }
0x1640   :  { %v1541_v35 = vpop.permute.xlu1 %1540 }
0x1641   :  { %v1543_v43 = vmul.f32 %v1541_v35, %v1526_v14 }
0x1643   :  { %v1544_v48 = vpack.c.bf16 %v1543_v43, %v1543_v43 }
0x1645   :  { %1669 = vrot.lane.b32.xlu1 %v1544_v48, %s2364_s25 }
0x1648   :  { %v1617_v31 = vpop.permute.xlu0 %1616 }
0x1649   :  { %v1619_v50 = vmul.f32 %v1617_v31, %v1599_v11 }
0x164b   :  { %v1620_v46 = vpack.c.bf16 %v1619_v50, %v1619_v50 }
0x164d   :  { %v1622_v44 = vrot.slane %v1620_v46, 3 }
0x164f   :  { %1623 = vrot.lane.b32.xlu0 %v1622_v44, %s2364_s25 }
0x16b7   :  { %v1670_v45 = vpop.permute.xlu1 %1669 }
0x16b8   :  { %2225 = vmatmul.mubr.msk.bf16.vlgmr.msra.gmra.mxu0 %vm126_vm6, %v1670_v45 }
0x16b9   :  { %2238 = vmatprep.mubr.msk.bf16.mxu0 %vm2361_vm1, %v2360_v0  ;;  %2237 = vmatpush3.bf16.msra.mxu0 %v2256_v49 }
0x16c1   :  { %v1624_v41 = vpop.permute.xlu0 %1623 }
0x16c2   :  { %2217 = vmatmul.mubr.msk.bf16.vlgmr.msra.gmra.mxu1 %vm126_vm6, %v1624_v41 }
0x16c3   :  { %2232 = vmatprep.mubr.msk.bf16.mxu1 %vm2361_vm1, %v2360_v0  ;;  %2229 = vmatpush3.bf16.msra.mxu1 %v2254_v7 }
0x16c4   :  { %2230 = vmatprep.subr.bf16.mxu1 %v2360_v0  ;;  %v16_v0 = vstv %s2900_s10 }
0x16c5   :  { %17 = vst [vmem:[#allocation2] sm:$0x1] %v16_v0 }
0x16c7   :  { %2231 = vmatpush3.bf16.msra.mxu1 %v2255_v18 }
0x16cc   :  { %v1948_v11 = vld [vmem:[#allocation2] ss:$0 sm:$0xff] }
0x1778   :  { %v1708_v33 = vpop.f32.mrf.mxu0 }
0x177a   :  { %v2226_v51 = vpop.f32.mrf.mxu0 }
0x177c   :  { %v1711_v52 = vpop.f32.mrf.mxu0 }
0x177e   :  { %v2227_v53 = vpop.f32.mrf.mxu0 }
0x1782   :  { %v1662_v3 = vpop.f32.mrf.mxu1 }
0x1783   :  { %v1663_v36 = vadd.f32 %v2834_v5, %v1662_v3 }
0x1784   :  { %v2218_v38 = vpop.f32.mrf.mxu1 }
0x1785   :  { %v1714_v54 = vadd.f32 %v1708_v33, %v1663_v36 }
0x1786   :  { %v1665_v55 = vpop.f32.mrf.mxu1 }
0x1787   :  { %v1715_v56 = vmul.f32 2.0, %v1714_v54 }
0x1788   :  { %v2219_v57 = vpop.f32.mrf.mxu1 }
0x1789   :  { %v1716_v58 = vsel %vm2464_vm5, %v1715_v56, %v1714_v54 }
0x178a   :  { %v1942_v59 = vmul.f32 -1.442695, %v1716_v58 }
0x178c   :  { %2347 = vpow2.f32 %v1942_v59 }
0x1799   :  { %v2348_v60 = vpop.eup %2347 }
0x179a   :  { %v1720_v37 = vadd.f32 1.0, %v2348_v60 }
0x179c   :  { %2349 = vrcp.f32 %v1720_v37 }
0x17a9   :  { %v2350_v61 = vpop.eup %2349 }
0x17aa   :  { %v1723_v62 = vmul.f32 2.0, %v2350_v61 }
0x17ac   :  { %v1943_v63 = vadd.f32 -1.0, %v1723_v62 }
0x17ae   :  { %v1725_v1 = vsel %vm2464_vm5, %v1943_v63, %v2350_v61 }
0x17af   :  { %1728 = vrot.lane.b32.xlu0 %v1725_v1, %s2363_s3  ;;  %v1726_v2 = vmul.f32 %v1725_v1, %v1537_v30 }
0x1821   :  { %v1729_v5 = vpop.permute.xlu0 %1728 }
0x1822   :  { %v1731_v39 = vmul.f32 %v1729_v5, %v1725_v1 }
0x1824   :  { %1733 = vrot.lane.b32.xlu1 %v1731_v39, %s2364_s25 }
0x1896   :  { %v1734_v4 = vpop.permute.xlu1 %1733 }
0x1897   :  { %v1736_v6 = vadd.f32 %v1734_v4, %v1726_v2 }
0x1899   :  { %2351 = vtanh.f32 %v1736_v6 }
0x18a6   :  { %v2352_v8 = vpop.eup %2351 }
0x18a7   :  { %1739 = vrot.lane.b32.xlu0 %v2352_v8, %s2363_s3 }
0x1919   :  { %v1740_v9 = vpop.permute.xlu0 %1739 }
0x191a   :  { %v1742_v10 = vmul.f32 %v1740_v9, %v1725_v1 }
0x191c   :  { %v1743_v12 = vpack.c.bf16 %v1742_v10, %v1742_v10 }
0x191e   :  { %1756 = vrot.lane.b32.xlu1 %v1743_v12, %s2364_s25 }
0x1990   :  { %v1757_v13 = vpop.permute.xlu1 %1756 }
0x1991   :  { %2233 = vmatmul.mubr.msk.bf16.vlgmr.msra.gmra.mxu1 %vm126_vm6, %v1757_v13 }
0x1a51   :  { %v1807_v16 = vpop.f32.mrf.mxu1 }
0x1a52   :  { %v1808_v17 = vadd.f32 %v1944_v15, %v1807_v16 }
0x1a53   :  { %v2234_v19 = vpop.f32.mrf.mxu1 }
0x1a54   :  { %v1813_v14 = vmax.f32 %v1808_v17, 0.0 }
0x1a55   :  { %v1810_v20 = vpop.f32.mrf.mxu1 }
0x1a56   :  { %v1814_v21 = vpack.c.bf16 %v1813_v14, %v1813_v14 }
0x1a57   :  { %v2235_v22 = vpop.f32.mrf.mxu1 }
0x1a58   :  { %2239 = vmatmul.mubr.msk.bf16.vlgmr.msra.gmra.mxu0 %vm1830_vm7, %v1814_v21 }
0x1b18   :  { %v1868_v23 = vpop.f32.mrf.mxu0 }
0x1b19   :  { %v1869_v24 = vadd.f32 %v1948_v11, %v1868_v23 }
0x1b1a   :  { %v2240_v25 = vpop.f32.mrf.mxu0 }
0x1b1b   :  { %1875 = vst.msk [vmem:[%s2902_s11] sm:$0x3] %vm1874_vm8, %v1869_v24 }
0x1b1c   :  { %v1871_v26 = vpop.f32.mrf.mxu0 }
0x1b1e   :  { %v2241_v27 = vpop.f32.mrf.mxu0 }

</bundles_post_ra>
